<compile_context>
chip_gen: v7x
topology: tpu7x:2x2x1
jax: 0.10.0
libtpu: 0.0.40
codegen_flags: <defaults>
</compile_context>

<pallas_src>
import math
import functools

import numpy as np
import jax
import jax.numpy as jnp
from jax import lax
from jax.experimental import pallas as pl
from jax.experimental.pallas import tpu as pltpu

# ---- small, self-consistent model dimensions ----
NUM_CHANNELS = 32          # d   (torch default 1536)
HIDDEN       = 64          # hidden width of each head (torch 512)
NUM_CLUSTERS = 8           # m   (torch 64)
CLUSTER_DIM  = 16          # l   (torch 128)
TOKEN_DIM    = 32          # g   (torch 256)
B            = 2
H = W        = 4
N            = H * W      # number of spatial tokens; must satisfy N > NUM_CLUSTERS
SINKHORN_ITERS = 3

SCORE_PAD  = 16            # score block padded to 16 lanes (>= NUM_CLUSTERS + 1)
TOTAL2     = CLUSTER_DIM + SCORE_PAD          # fused 2nd-layer width (32 lanes)
OUT_DIM    = TOKEN_DIM + CLUSTER_DIM * NUM_CLUSTERS   # 160-lane output
BATCH_TILE = 1             # batch items per grid step (grid = B // BATCH_TILE)
NEG        = -1e9          # "minus infinity" for padded Sinkhorn columns

assert NUM_CLUSTERS + 1 <= SCORE_PAD
assert N > NUM_CLUSTERS


def _salad_kernel(x_ref, t_ref,
                  w1_ref, b1_ref, w2_ref, b2_ref,
                  wt1_ref, bt1_ref, wt2_ref, bt2_ref,
                  loga_ref, et_ref, gmat_ref,
                  out_ref,
                  *, num_clusters, sinkhorn_iters):
    f32 = jnp.float32
    bt, n, c = x_ref.shape                # batch tile, spatial tokens, channels
    m = num_clusters
    total2 = w2_ref.shape[1]              # CLUSTER_DIM + SCORE_PAD
    out_dim = out_ref.shape[-1]           # TOKEN_DIM + CLUSTER_DIM * NUM_CLUSTERS

    xb = x_ref[...].reshape(bt * n, c).astype(f32)    # [Bt*N, C]
    tb = t_ref[...].reshape(bt, c).astype(f32)        # [Bt, C]

    # ---- fused cluster|score heads: one 128-lane hidden, block-diag 2nd layer ----
    h = jnp.maximum(
        jnp.dot(xb, w1_ref[...], preferred_element_type=f32) + b1_ref[...], 0.0)
    s2 = jnp.dot(h, w2_ref[...], preferred_element_type=f32) + b2_ref[...]
    # s2 columns: [0:l] cluster feats f, [l:l+m] scores, [l+m] dustbin, rest = -1e9.

    # ---- token head (output already placed in lanes [0:g] of the 160-wide row) ----
    ht = jnp.maximum(
        jnp.dot(tb, wt1_ref[...], preferred_element_type=f32) + bt1_ref[...], 0.0)
    tok = jnp.dot(ht, wt2_ref[...], preferred_element_type=f32) + bt2_ref[...]

    # ---- log-domain Sinkhorn, transposed orientation, padded to 32 lanes ----
    # log_a is -1e9 on every non-score column, so those columns contribute exactly
    # exp(-1e9) = 0 to each row logsumexp -> identical to the unpadded recursion.
    M = s2.reshape(bt, n, total2)
    norm = -math.log(n + m)
    log_a = loga_ref[...].reshape(1, 1, total2)
    u = jnp.zeros((bt, 1, total2), f32)
    v = jnp.zeros((bt, n, 1), f32)
    for _ in range(sinkhorn_iters):
        z = M + v
        zmax = jnp.max(z, axis=1, keepdims=True)
        u = log_a - (zmax + jnp.log(jnp.sum(jnp.exp(z - zmax), axis=1, keepdims=True)))
        z = M + u
        zmax = jnp.max(z, axis=2, keepdims=True)
        v = norm - (zmax + jnp.log(jnp.sum(jnp.exp(z - zmax), axis=2, keepdims=True)))
    p = jnp.exp(M + u + v - norm).reshape(bt * n, total2)

    # ---- aggregation straight into the flattened [g + l*m] lane layout ----
    # lane (g + l_idx*m + c): E scatters the f columns, T scatters the p columns.
    f_rep = jnp.dot(s2, et_ref[0], preferred_element_type=f32)   # [Bt*N, 160]
    p_rep = jnp.dot(p,  et_ref[1], preferred_element_type=f32)   # [Bt*N, 160]
    agg = jnp.sum((f_rep * p_rep).reshape(bt, n, out_dim), axis=1)   # [Bt, 160]

    # per-cluster L2 norm (broadcast via the cluster-mask matmul) + token L2 norm
    eps2 = 1e-24
    denom = jnp.dot(agg * agg, gmat_ref[...], preferred_element_type=f32)
    agg_n = agg * lax.rsqrt(jnp.maximum(denom, eps2))
    tok_n = tok * lax.rsqrt(
        jnp.maximum(jnp.sum(tok * tok, axis=-1, keepdims=True), eps2))

    # token lives in lanes [0:g], clusters in lanes [g:]; the two are disjoint.
    vec = tok_n + agg_n
    vec = vec * lax.rsqrt(
        jnp.maximum(jnp.sum(vec * vec, axis=-1, keepdims=True), eps2))
    out_ref[...] = vec.reshape(bt, 1, out_dim).astype(out_ref.dtype)


def prepare_params(params, n_tokens):
    """Fuse / pad the per-head weights ONCE (host side) into the kernel layout."""
    f32 = jnp.float32
    l, m, g = CLUSTER_DIM, NUM_CLUSTERS, TOKEN_DIM
    hid = params["wc2"].shape[0]
    total2, out_dim = TOTAL2, OUT_DIM

    # fused first layer (cluster | score): one [C, 2*HIDDEN] = [C, 128] matmul
    w1 = jnp.concatenate([params["wc1"], params["ws1"]], axis=1)
    b1 = jnp.concatenate([params["bc1"], params["bs1"]], axis=1)

    # fused block-diagonal second layer: cols [0:l] cluster feats, [l:l+m] scores,
    # [l+m] dustbin (bias only), remaining pad columns get a -1e9 bias.
    w2 = jnp.zeros((2 * hid, total2), f32)
    w2 = w2.at[:hid, :l].set(params["wc2"])
    w2 = w2.at[hid:, l:l + m].set(params["ws2"])
    b2 = jnp.full((1, total2), NEG, f32)
    b2 = b2.at[:, :l].set(params["bc2"])
    b2 = b2.at[:, l:l + m].set(params["bs2"])
    b2 = b2.at[:, l + m].set(params["dust"])

    # token second layer padded to the 160-lane output layout (token -> lanes [0:g])
    wt2a = jnp.zeros((hid, out_dim), f32).at[:, :g].set(params["wt2"])
    bt2a = jnp.zeros((1, out_dim), f32).at[:, :g].set(params["bt2"])

    # Sinkhorn log_a over the padded 32 columns (host-side constant)
    norm = -math.log(n_tokens + m)
    log_a = np.full((1, total2), NEG, np.float32)
    log_a[0, l:l + m + 1] = norm
    log_a[0, l + m] += math.log(n_tokens - m)

    # 0/1 placement constants for the flattened [g + l*m] lane layout
    k = np.arange(out_dim)
    agg_lane = k >= g
    l_of_k = np.where(agg_lane, (k - g) // m, -1)
    c_of_k = np.where(agg_lane, (k - g) % m, -1)
    j = np.arange(total2)[:, None]
    e_mat = ((j == l_of_k[None, :]) & agg_lane[None, :]).astype(np.float32)
    t_mat = ((j == (l + c_of_k)[None, :]) & agg_lane[None, :]).astype(np.float32)
    et = np.stack([e_mat, t_mat])                                      # [2, 32, 160]
    gmat = ((c_of_k[:, None] == c_of_k[None, :])
            & agg_lane[:, None] & agg_lane[None, :]).astype(np.float32)  # [160, 160]

    return dict(w1=w1, b1=b1, w2=w2, b2=b2,
                wt1=params["wt1"], bt1=params["bt1"], wt2=wt2a, bt2=bt2a,
                log_a=jnp.asarray(log_a), et=jnp.asarray(et), gmat=jnp.asarray(gmat))


def salad_forward(x, t, fparams):
    """x: [B, N, C] channel-last flattened feature map; t: [B, C] token."""
    Bq, n, c = x.shape
    dtype = x.dtype
    bt = BATCH_TILE
    assert Bq % bt == 0

    t3 = t[:, None, :]                                    # [B, 1, C]

    weights = (fparams["w1"], fparams["b1"], fparams["w2"], fparams["b2"],
               fparams["wt1"], fparams["bt1"], fparams["wt2"], fparams["bt2"],
               fparams["log_a"], fparams["et"], fparams["gmat"])

    def full_spec(arr):
        nd = arr.ndim
        return pl.BlockSpec(arr.shape, lambda b: (0,) * nd)

    in_specs = [
        pl.BlockSpec((bt, n, c), lambda b: (b, 0, 0)),
        pl.BlockSpec((bt, 1, c), lambda b: (b, 0, 0)),
    ] + [full_spec(w) for w in weights]

    out_specs = pl.BlockSpec((bt, 1, OUT_DIM), lambda b: (b, 0, 0))
    out_shape = jax.ShapeDtypeStruct((Bq, 1, OUT_DIM), dtype)

    kernel = functools.partial(_salad_kernel,
                               num_clusters=NUM_CLUSTERS,
                               sinkhorn_iters=SINKHORN_ITERS)

    out = pl.pallas_call(
        kernel,
        grid=(Bq // bt,),
        in_specs=in_specs,
        out_specs=out_specs,
        out_shape=out_shape,
        compiler_params=pltpu.CompilerParams(
            dimension_semantics=("parallel",)),
    )(x, t3, *weights)

    return out[:, 0, :]       # trivial squeeze; kernel output is already lane-dense


# ---------------- pure-JAX reference (mirrors the torch module) ----------------
def salad_reference(x, t, params):
    hp = lax.Precision.HIGHEST
    Bq, n, c = x.shape
    m, l = NUM_CLUSTERS, CLUSTER_DIM

    h = jax.nn.relu(jnp.einsum("bnc,ch->bnh", x, params["wc1"], precision=hp)
                    + params["bc1"])
    f = jnp.einsum("bnh,hl->bnl", h, params["wc2"], precision=hp) + params["bc2"]

    hs = jax.nn.relu(jnp.einsum("bnc,ch->bnh", x, params["ws1"], precision=hp)
                     + params["bs1"])
    s = jnp.einsum("bnh,hm->bnm", hs, params["ws2"], precision=hp) + params["bs2"]

    ht = jax.nn.relu(jnp.matmul(t, params["wt1"], precision=hp) + params["bt1"])
    tok = jnp.matmul(ht, params["wt2"], precision=hp) + params["bt2"]

    # S_aug in torch orientation [B, m+1, n]
    s_t = jnp.swapaxes(s, 1, 2)
    dust_row = jnp.broadcast_to(params["dust"], (Bq, 1, n))
    s_aug = jnp.concatenate([s_t, dust_row], axis=1)

    norm = -math.log(n + m)
    log_a = jnp.full((m + 1,), norm).at[-1].add(math.log(n - m))
    log_b = jnp.full((n,), norm)
    M = s_aug / 1.0
    u = jnp.zeros((Bq, m + 1))
    v = jnp.zeros((Bq, n))
    for _ in range(SINKHORN_ITERS):
        u = log_a - jax.scipy.special.logsumexp(M + v[:, None, :], axis=2)
        v = log_b - jax.scipy.special.logsumexp(M + u[:, :, None], axis=1)
    log_p = M + u[:, :, None] + v[:, None, :] - norm
    p = jnp.exp(log_p)[:, :m, :]                       # [B, m, n]

    f_t = jnp.swapaxes(f, 1, 2)                        # [B, l, n]
    agg = jnp.einsum("bln,bmn->blm", f_t, p, precision=hp)

    eps = 1e-12
    agg_n = agg / jnp.maximum(jnp.linalg.norm(agg, axis=1, keepdims=True), eps)
    tok_n = tok / jnp.maximum(jnp.linalg.norm(tok, axis=-1, keepdims=True), eps)
    out = jnp.concatenate([tok_n, agg_n.reshape(Bq, l * m)], axis=-1)
    return out / jnp.maximum(jnp.linalg.norm(out, axis=-1, keepdims=True), eps)


# ---------------- deterministic parameter init ----------------
def init_params(key):
    def linear(k, fan_in, fan_out):
        kw, kb = jax.random.split(k)
        bound = 1.0 / math.sqrt(fan_in)
        w = jax.random.uniform(kw, (fan_in, fan_out), jnp.float32, -bound, bound)
        b = jax.random.uniform(kb, (1, fan_out), jnp.float32, -bound, bound)
        return w, b

    keys = jax.random.split(key, 6)
    wc1, bc1 = linear(keys[0], NUM_CHANNELS, HIDDEN)
    wc2, bc2 = linear(keys[1], HIDDEN, CLUSTER_DIM)
    ws1, bs1 = linear(keys[2], NUM_CHANNELS, HIDDEN)
    ws2, bs2 = linear(keys[3], HIDDEN, NUM_CLUSTERS)
    wt1, bt1 = linear(keys[4], NUM_CHANNELS, HIDDEN)
    wt2, bt2 = linear(keys[5], HIDDEN, TOKEN_DIM)
    return dict(wc1=wc1, bc1=bc1, wc2=wc2, bc2=bc2,
                ws1=ws1, bs1=bs1, ws2=ws2, bs2=bs2,
                wt1=wt1, bt1=bt1, wt2=wt2, bt2=bt2,
                dust=jnp.asarray(1.0, jnp.float32))


if __name__ == "__main__":
    key = jax.random.PRNGKey(0)
    k_x, k_t, k_p = jax.random.split(key, 3)

    params = init_params(k_p)
    fused = prepare_params(params, N)     # one-time host-side fusion / padding

    # x: [B, N, C]  (channel-last flattened feature map), t: [B, C]
    x = jax.random.normal(k_x, (B, N, NUM_CHANNELS), jnp.float32)
    t = jax.random.normal(k_t, (B, NUM_CHANNELS), jnp.float32)

    out = jax.jit(salad_forward)(x, t, fused)
    out = jax.block_until_ready(out)

    ref = salad_reference(x, t, params)
    assert out.shape == (B, TOKEN_DIM + CLUSTER_DIM * NUM_CLUSTERS), out.shape
    assert bool(jnp.all(jnp.isfinite(out)))
    max_err = float(jnp.max(jnp.abs(out - ref)))
    assert max_err < 1e-2, f"mismatch vs reference: {max_err}"

    print("KERNEL_OK")
</pallas_src>

<mosaic_0001>
module attributes {stable_mosaic.version = 11 : i64} {
  func.func @_salad_kernel(%arg0: i32, %arg1: memref<1x16x32xf32, #tpu.memory_space<vmem>>, %arg2: memref<1x1x32xf32, #tpu.memory_space<vmem>>, %arg3: memref<32x128xf32, #tpu.memory_space<vmem>>, %arg4: memref<1x128xf32, #tpu.memory_space<vmem>>, %arg5: memref<128x32xf32, #tpu.memory_space<vmem>>, %arg6: memref<1x32xf32, #tpu.memory_space<vmem>>, %arg7: memref<32x64xf32, #tpu.memory_space<vmem>>, %arg8: memref<1x64xf32, #tpu.memory_space<vmem>>, %arg9: memref<64x160xf32, #tpu.memory_space<vmem>>, %arg10: memref<1x160xf32, #tpu.memory_space<vmem>>, %arg11: memref<1x32xf32, #tpu.memory_space<vmem>>, %arg12: memref<2x32x160xf32, #tpu.memory_space<vmem>>, %arg13: memref<160x160xf32, #tpu.memory_space<vmem>>, %arg14: memref<1x1x160xf32, #tpu.memory_space<vmem>>) attributes {dimension_semantics = [#tpu.dimension_semantics<parallel>], iteration_bounds = array<i64: 2>, scalar_prefetch = 0 : i64, scratch_operands = 0 : i64, tpu.core_type = #tpu.core_type<tc>, window_params = [{transform_indices = @transform_0, window_bounds = array<i64: 1, 16, 32>}, {transform_indices = @transform_1, window_bounds = array<i64: 1, 1, 32>}, {pipeline_mode = #tpu.pipeline_mode<synchronous>, transform_indices = @transform_2, window_bounds = array<i64: 32, 128>}, {pipeline_mode = #tpu.pipeline_mode<synchronous>, transform_indices = @transform_3, window_bounds = array<i64: 1, 128>}, {pipeline_mode = #tpu.pipeline_mode<synchronous>, transform_indices = @transform_4, window_bounds = array<i64: 128, 32>}, {pipeline_mode = #tpu.pipeline_mode<synchronous>, transform_indices = @transform_5, window_bounds = array<i64: 1, 32>}, {pipeline_mode = #tpu.pipeline_mode<synchronous>, transform_indices = @transform_6, window_bounds = array<i64: 32, 64>}, {pipeline_mode = #tpu.pipeline_mode<synchronous>, transform_indices = @transform_7, window_bounds = array<i64: 1, 64>}, {pipeline_mode = #tpu.pipeline_mode<synchronous>, transform_indices = @transform_8, window_bounds = array<i64: 64, 160>}, {pipeline_mode = #tpu.pipeline_mode<synchronous>, transform_indices = @transform_9, window_bounds = array<i64: 1, 160>}, {pipeline_mode = #tpu.pipeline_mode<synchronous>, transform_indices = @transform_10, window_bounds = array<i64: 1, 32>}, {pipeline_mode = #tpu.pipeline_mode<synchronous>, transform_indices = @transform_11, window_bounds = array<i64: 2, 32, 160>}, {pipeline_mode = #tpu.pipeline_mode<synchronous>, transform_indices = @transform_12, window_bounds = array<i64: 160, 160>}, {transform_indices = @transform_13, window_bounds = array<i64: 1, 1, 160>}]} {
    %c0 = arith.constant 0 : index
    %c0_0 = arith.constant 0 : index
    %c0_1 = arith.constant 0 : index
    %0 = vector.load %arg1[%c0, %c0_0, %c0_1] : memref<1x16x32xf32, #tpu.memory_space<vmem>>, vector<1x16x32xf32>
    %1 = vector.shape_cast %0 : vector<1x16x32xf32> to vector<16x32xf32>
    %c0_2 = arith.constant 0 : index
    %c0_3 = arith.constant 0 : index
    %c0_4 = arith.constant 0 : index
    %2 = vector.load %arg2[%c0_2, %c0_3, %c0_4] : memref<1x1x32xf32, #tpu.memory_space<vmem>>, vector<1x1x32xf32>
    %3 = vector.shape_cast %2 : vector<1x1x32xf32> to vector<1x32xf32>
    %c0_5 = arith.constant 0 : index
    %c0_6 = arith.constant 0 : index
    %4 = vector.load %arg3[%c0_5, %c0_6] : memref<32x128xf32, #tpu.memory_space<vmem>>, vector<32x128xf32>
    %cst = arith.constant dense<0.000000e+00> : vector<16x128xf32>
    %5 = tpu.matmul %1, %4, %cst {dimension_numbers = #tpu.dot_dimension_numbers<[1], [0], [0], [1], [0, 0, 1, 1], [], []>} : vector<16x32xf32>, vector<32x128xf32>, vector<16x128xf32> -> vector<16x128xf32>
    %c0_7 = arith.constant 0 : index
    %c0_8 = arith.constant 0 : index
    %6 = vector.load %arg4[%c0_7, %c0_8] : memref<1x128xf32, #tpu.memory_space<vmem>>, vector<1x128xf32>
    %7 = vector.broadcast %6 : vector<1x128xf32> to vector<16x128xf32>
    %8 = arith.addf %5, %7 : vector<16x128xf32>
    %cst_9 = arith.constant 0.000000e+00 : f32
    %9 = vector.broadcast %cst_9 : f32 to vector<16x128xf32>
    %10 = arith.maximumf %8, %9 : vector<16x128xf32>
    %c0_10 = arith.constant 0 : index
    %c0_11 = arith.constant 0 : index
    %11 = vector.load %arg5[%c0_10, %c0_11] : memref<128x32xf32, #tpu.memory_space<vmem>>, vector<128x32xf32>
    %cst_12 = arith.constant dense<0.000000e+00> : vector<16x32xf32>
    %12 = tpu.matmul %10, %11, %cst_12 {dimension_numbers = #tpu.dot_dimension_numbers<[1], [0], [0], [1], [0, 0, 1, 1], [], []>} : vector<16x128xf32>, vector<128x32xf32>, vector<16x32xf32> -> vector<16x32xf32>
    %c0_13 = arith.constant 0 : index
    %c0_14 = arith.constant 0 : index
    %13 = vector.load %arg6[%c0_13, %c0_14] : memref<1x32xf32, #tpu.memory_space<vmem>>, vector<1x32xf32>
    %14 = vector.broadcast %13 : vector<1x32xf32> to vector<16x32xf32>
    %15 = arith.addf %12, %14 : vector<16x32xf32>
    %c0_15 = arith.constant 0 : index
    %c0_16 = arith.constant 0 : index
    %16 = vector.load %arg7[%c0_15, %c0_16] : memref<32x64xf32, #tpu.memory_space<vmem>>, vector<32x64xf32>
    %cst_17 = arith.constant dense<0.000000e+00> : vector<1x64xf32>
    %17 = tpu.matmul %3, %16, %cst_17 {dimension_numbers = #tpu.dot_dimension_numbers<[1], [0], [0], [1], [0, 0, 1, 1], [], []>} : vector<1x32xf32>, vector<32x64xf32>, vector<1x64xf32> -> vector<1x64xf32>
    %c0_18 = arith.constant 0 : index
    %c0_19 = arith.constant 0 : index
    %18 = vector.load %arg8[%c0_18, %c0_19] : memref<1x64xf32, #tpu.memory_space<vmem>>, vector<1x64xf32>
    %19 = arith.addf %17, %18 : vector<1x64xf32>
    %cst_20 = arith.constant 0.000000e+00 : f32
    %20 = vector.broadcast %cst_20 : f32 to vector<1x64xf32>
    %21 = arith.maximumf %19, %20 : vector<1x64xf32>
    %c0_21 = arith.constant 0 : index
    %c0_22 = arith.constant 0 : index
    %22 = vector.load %arg9[%c0_21, %c0_22] : memref<64x160xf32, #tpu.memory_space<vmem>>, vector<64x160xf32>
    %cst_23 = arith.constant dense<0.000000e+00> : vector<1x160xf32>
    %23 = tpu.matmul %21, %22, %cst_23 {dimension_numbers = #tpu.dot_dimension_numbers<[1], [0], [0], [1], [0, 0, 1, 1], [], []>} : vector<1x64xf32>, vector<64x160xf32>, vector<1x160xf32> -> vector<1x160xf32>
    %c0_24 = arith.constant 0 : index
    %c0_25 = arith.constant 0 : index
    %24 = vector.load %arg10[%c0_24, %c0_25] : memref<1x160xf32, #tpu.memory_space<vmem>>, vector<1x160xf32>
    %25 = arith.addf %23, %24 : vector<1x160xf32>
    %26 = vector.shape_cast %15 : vector<16x32xf32> to vector<1x16x32xf32>
    %c0_26 = arith.constant 0 : index
    %c0_27 = arith.constant 0 : index
    %27 = vector.load %arg11[%c0_26, %c0_27] : memref<1x32xf32, #tpu.memory_space<vmem>>, vector<1x32xf32>
    %28 = vector.shape_cast %27 : vector<1x32xf32> to vector<1x1x32xf32>
    %cst_28 = arith.constant 0.000000e+00 : f32
    %29 = vector.broadcast %cst_28 : f32 to vector<1x16x1xf32>
    %30 = vector.broadcast %29 : vector<1x16x1xf32> to vector<1x16x32xf32>
    %31 = arith.addf %26, %30 : vector<1x16x32xf32>
    %cst_29 = arith.constant dense<0xFF800000> : vector<1x32xf32>
    %32 = vector.multi_reduction <maximumf>, %31, %cst_29 [1] : vector<1x16x32xf32> to vector<1x32xf32>
    %33 = vector.shape_cast %32 : vector<1x32xf32> to vector<1x1x32xf32>
    %34 = vector.broadcast %33 : vector<1x1x32xf32> to vector<1x16x32xf32>
    %35 = arith.subf %31, %34 : vector<1x16x32xf32>
    %36 = math.exp %35 : vector<1x16x32xf32>
    %cst_30 = arith.constant dense<0.000000e+00> : vector<1x32xf32>
    %37 = vector.multi_reduction <add>, %36, %cst_30 [1] : vector<1x16x32xf32> to vector<1x32xf32>
    %38 = vector.shape_cast %37 : vector<1x32xf32> to vector<1x1x32xf32>
    %39 = math.log %38 : vector<1x1x32xf32>
    %40 = arith.addf %33, %39 : vector<1x1x32xf32>
    %41 = arith.subf %28, %40 : vector<1x1x32xf32>
    %42 = vector.broadcast %41 : vector<1x1x32xf32> to vector<1x16x32xf32>
    %43 = arith.addf %26, %42 : vector<1x16x32xf32>
    %cst_31 = arith.constant dense<0xFF800000> : vector<1x16xf32>
    %44 = vector.multi_reduction <maximumf>, %43, %cst_31 [2] : vector<1x16x32xf32> to vector<1x16xf32>
    %45 = vector.shape_cast %44 : vector<1x16xf32> to vector<1x16x1xf32>
    %46 = vector.broadcast %45 : vector<1x16x1xf32> to vector<1x16x32xf32>
    %47 = arith.subf %43, %46 : vector<1x16x32xf32>
    %48 = math.exp %47 : vector<1x16x32xf32>
    %cst_32 = arith.constant dense<0.000000e+00> : vector<1x16xf32>
    %49 = vector.multi_reduction <add>, %48, %cst_32 [2] : vector<1x16x32xf32> to vector<1x16xf32>
    %50 = vector.shape_cast %49 : vector<1x16xf32> to vector<1x16x1xf32>
    %51 = math.log %50 : vector<1x16x1xf32>
    %52 = arith.addf %45, %51 : vector<1x16x1xf32>
    %cst_33 = arith.constant -3.17805386 : f32
    %53 = vector.broadcast %cst_33 : f32 to vector<1x16x1xf32>
    %54 = arith.subf %53, %52 : vector<1x16x1xf32>
    %55 = vector.broadcast %54 : vector<1x16x1xf32> to vector<1x16x32xf32>
    %56 = arith.addf %26, %55 : vector<1x16x32xf32>
    %cst_34 = arith.constant dense<0xFF800000> : vector<1x32xf32>
    %57 = vector.multi_reduction <maximumf>, %56, %cst_34 [1] : vector<1x16x32xf32> to vector<1x32xf32>
    %58 = vector.shape_cast %57 : vector<1x32xf32> to vector<1x1x32xf32>
    %59 = vector.broadcast %58 : vector<1x1x32xf32> to vector<1x16x32xf32>
    %60 = arith.subf %56, %59 : vector<1x16x32xf32>
    %61 = math.exp %60 : vector<1x16x32xf32>
    %cst_35 = arith.constant dense<0.000000e+00> : vector<1x32xf32>
    %62 = vector.multi_reduction <add>, %61, %cst_35 [1] : vector<1x16x32xf32> to vector<1x32xf32>
    %63 = vector.shape_cast %62 : vector<1x32xf32> to vector<1x1x32xf32>
    %64 = math.log %63 : vector<1x1x32xf32>
    %65 = arith.addf %58, %64 : vector<1x1x32xf32>
    %66 = arith.subf %28, %65 : vector<1x1x32xf32>
    %67 = vector.broadcast %66 : vector<1x1x32xf32> to vector<1x16x32xf32>
    %68 = arith.addf %26, %67 : vector<1x16x32xf32>
    %cst_36 = arith.constant dense<0xFF800000> : vector<1x16xf32>
    %69 = vector.multi_reduction <maximumf>, %68, %cst_36 [2] : vector<1x16x32xf32> to vector<1x16xf32>
    %70 = vector.shape_cast %69 : vector<1x16xf32> to vector<1x16x1xf32>
    %71 = vector.broadcast %70 : vector<1x16x1xf32> to vector<1x16x32xf32>
    %72 = arith.subf %68, %71 : vector<1x16x32xf32>
    %73 = math.exp %72 : vector<1x16x32xf32>
    %cst_37 = arith.constant dense<0.000000e+00> : vector<1x16xf32>
    %74 = vector.multi_reduction <add>, %73, %cst_37 [2] : vector<1x16x32xf32> to vector<1x16xf32>
    %75 = vector.shape_cast %74 : vector<1x16xf32> to vector<1x16x1xf32>
    %76 = math.log %75 : vector<1x16x1xf32>
    %77 = arith.addf %70, %76 : vector<1x16x1xf32>
    %cst_38 = arith.constant -3.17805386 : f32
    %78 = vector.broadcast %cst_38 : f32 to vector<1x16x1xf32>
    %79 = arith.subf %78, %77 : vector<1x16x1xf32>
    %80 = vector.broadcast %79 : vector<1x16x1xf32> to vector<1x16x32xf32>
    %81 = arith.addf %26, %80 : vector<1x16x32xf32>
    %cst_39 = arith.constant dense<0xFF800000> : vector<1x32xf32>
    %82 = vector.multi_reduction <maximumf>, %81, %cst_39 [1] : vector<1x16x32xf32> to vector<1x32xf32>
    %83 = vector.shape_cast %82 : vector<1x32xf32> to vector<1x1x32xf32>
    %84 = vector.broadcast %83 : vector<1x1x32xf32> to vector<1x16x32xf32>
    %85 = arith.subf %81, %84 : vector<1x16x32xf32>
    %86 = math.exp %85 : vector<1x16x32xf32>
    %cst_40 = arith.constant dense<0.000000e+00> : vector<1x32xf32>
    %87 = vector.multi_reduction <add>, %86, %cst_40 [1] : vector<1x16x32xf32> to vector<1x32xf32>
    %88 = vector.shape_cast %87 : vector<1x32xf32> to vector<1x1x32xf32>
    %89 = math.log %88 : vector<1x1x32xf32>
    %90 = arith.addf %83, %89 : vector<1x1x32xf32>
    %91 = arith.subf %28, %90 : vector<1x1x32xf32>
    %92 = vector.broadcast %91 : vector<1x1x32xf32> to vector<1x16x32xf32>
    %93 = arith.addf %26, %92 : vector<1x16x32xf32>
    %cst_41 = arith.constant dense<0xFF800000> : vector<1x16xf32>
    %94 = vector.multi_reduction <maximumf>, %93, %cst_41 [2] : vector<1x16x32xf32> to vector<1x16xf32>
    %95 = vector.shape_cast %94 : vector<1x16xf32> to vector<1x16x1xf32>
    %96 = vector.broadcast %95 : vector<1x16x1xf32> to vector<1x16x32xf32>
    %97 = arith.subf %93, %96 : vector<1x16x32xf32>
    %98 = math.exp %97 : vector<1x16x32xf32>
    %cst_42 = arith.constant dense<0.000000e+00> : vector<1x16xf32>
    %99 = vector.multi_reduction <add>, %98, %cst_42 [2] : vector<1x16x32xf32> to vector<1x16xf32>
    %100 = vector.shape_cast %99 : vector<1x16xf32> to vector<1x16x1xf32>
    %101 = math.log %100 : vector<1x16x1xf32>
    %102 = arith.addf %95, %101 : vector<1x16x1xf32>
    %cst_43 = arith.constant -3.17805386 : f32
    %103 = vector.broadcast %cst_43 : f32 to vector<1x16x1xf32>
    %104 = arith.subf %103, %102 : vector<1x16x1xf32>
    %105 = vector.broadcast %91 : vector<1x1x32xf32> to vector<1x16x32xf32>
    %106 = arith.addf %26, %105 : vector<1x16x32xf32>
    %107 = vector.broadcast %104 : vector<1x16x1xf32> to vector<1x16x32xf32>
    %108 = arith.addf %106, %107 : vector<1x16x32xf32>
    %cst_44 = arith.constant -3.17805386 : f32
    %109 = vector.broadcast %cst_44 : f32 to vector<1x16x32xf32>
    %110 = arith.subf %108, %109 : vector<1x16x32xf32>
    %111 = math.exp %110 : vector<1x16x32xf32>
    %112 = vector.shape_cast %111 : vector<1x16x32xf32> to vector<16x32xf32>
    %c0_45 = arith.constant 0 : index
    %c0_46 = arith.constant 0 : index
    %c0_47 = arith.constant 0 : index
    %113 = vector.load %arg12[%c0_45, %c0_46, %c0_47] : memref<2x32x160xf32, #tpu.memory_space<vmem>>, vector<1x32x160xf32>
    %114 = vector.shape_cast %113 : vector<1x32x160xf32> to vector<32x160xf32>
    %cst_48 = arith.constant dense<0.000000e+00> : vector<16x160xf32>
    %115 = tpu.matmul %15, %114, %cst_48 {dimension_numbers = #tpu.dot_dimension_numbers<[1], [0], [0], [1], [0, 0, 1, 1], [], []>} : vector<16x32xf32>, vector<32x160xf32>, vector<16x160xf32> -> vector<16x160xf32>
    %c1 = arith.constant 1 : index
    %c0_49 = arith.constant 0 : index
    %c0_50 = arith.constant 0 : index
    %116 = vector.load %arg12[%c1, %c0_49, %c0_50] : memref<2x32x160xf32, #tpu.memory_space<vmem>>, vector<1x32x160xf32>
    %117 = vector.shape_cast %116 : vector<1x32x160xf32> to vector<32x160xf32>
    %cst_51 = arith.constant dense<0.000000e+00> : vector<16x160xf32>
    %118 = tpu.matmul %112, %117, %cst_51 {dimension_numbers = #tpu.dot_dimension_numbers<[1], [0], [0], [1], [0, 0, 1, 1], [], []>} : vector<16x32xf32>, vector<32x160xf32>, vector<16x160xf32> -> vector<16x160xf32>
    %119 = arith.mulf %115, %118 : vector<16x160xf32>
    %120 = vector.shape_cast %119 : vector<16x160xf32> to vector<1x16x160xf32>
    %cst_52 = arith.constant dense<0.000000e+00> : vector<1x160xf32>
    %121 = vector.multi_reduction <add>, %120, %cst_52 [1] : vector<1x16x160xf32> to vector<1x160xf32>
    %122 = arith.mulf %121, %121 : vector<1x160xf32>
    %c0_53 = arith.constant 0 : index
    %c0_54 = arith.constant 0 : index
    %123 = vector.load %arg13[%c0_53, %c0_54] : memref<160x160xf32, #tpu.memory_space<vmem>>, vector<160x160xf32>
    %cst_55 = arith.constant dense<0.000000e+00> : vector<1x160xf32>
    %124 = tpu.matmul %122, %123, %cst_55 {dimension_numbers = #tpu.dot_dimension_numbers<[1], [0], [0], [1], [0, 0, 1, 1], [], []>} : vector<1x160xf32>, vector<160x160xf32>, vector<1x160xf32> -> vector<1x160xf32>
    %cst_56 = arith.constant 1.000000e-24 : f32
    %125 = vector.broadcast %cst_56 : f32 to vector<1x160xf32>
    %126 = arith.maximumf %124, %125 : vector<1x160xf32>
    %127 = math.rsqrt %126 : vector<1x160xf32>
    %128 = arith.mulf %121, %127 : vector<1x160xf32>
    %129 = arith.mulf %25, %25 : vector<1x160xf32>
    %cst_57 = arith.constant dense<0.000000e+00> : vector<1xf32>
    %130 = vector.multi_reduction <add>, %129, %cst_57 [1] : vector<1x160xf32> to vector<1xf32>
    %131 = vector.shape_cast %130 : vector<1xf32> to vector<1x1xf32>
    %cst_58 = arith.constant 1.000000e-24 : f32
    %132 = vector.broadcast %cst_58 : f32 to vector<1x1xf32>
    %133 = arith.maximumf %131, %132 : vector<1x1xf32>
    %134 = math.rsqrt %133 : vector<1x1xf32>
    %135 = vector.broadcast %134 : vector<1x1xf32> to vector<1x160xf32>
    %136 = arith.mulf %25, %135 : vector<1x160xf32>
    %137 = arith.addf %136, %128 : vector<1x160xf32>
    %138 = arith.mulf %137, %137 : vector<1x160xf32>
    %cst_59 = arith.constant dense<0.000000e+00> : vector<1xf32>
    %139 = vector.multi_reduction <add>, %138, %cst_59 [1] : vector<1x160xf32> to vector<1xf32>
    %140 = vector.shape_cast %139 : vector<1xf32> to vector<1x1xf32>
    %cst_60 = arith.constant 1.000000e-24 : f32
    %141 = vector.broadcast %cst_60 : f32 to vector<1x1xf32>
    %142 = arith.maximumf %140, %141 : vector<1x1xf32>
    %143 = math.rsqrt %142 : vector<1x1xf32>
    %144 = vector.broadcast %143 : vector<1x1xf32> to vector<1x160xf32>
    %145 = arith.mulf %137, %144 : vector<1x160xf32>
    %146 = vector.shape_cast %145 : vector<1x160xf32> to vector<1x1x160xf32>
    %c0_61 = arith.constant 0 : index
    %c0_62 = arith.constant 0 : index
    %c0_63 = arith.constant 0 : index
    %147 = vector.load %arg14[%c0_61, %c0_62, %c0_63] : memref<1x1x160xf32, #tpu.memory_space<vmem>>, vector<1x1x160xf32>
    tpu.vector_store %arg14[%c0_61, %c0_62, %c0_63], %146 {strides = array<i32>} : memref<1x1x160xf32, #tpu.memory_space<vmem>>, vector<1x1x160xf32>,
    return
  }
  func.func @transform_0(%arg0: i32) -> (i32, i32, i32) {
    %c0_i32 = arith.constant 0 : i32
    %c0_i32_0 = arith.constant 0 : i32
    %c0_i32_1 = arith.constant 0 : i32
    return %arg0, %c0_i32, %c0_i32_0 : i32, i32, i32
  }
  func.func @transform_1(%arg0: i32) -> (i32, i32, i32) {
    %c0_i32 = arith.constant 0 : i32
    %c0_i32_0 = arith.constant 0 : i32
    %c0_i32_1 = arith.constant 0 : i32
    return %arg0, %c0_i32, %c0_i32_0 : i32, i32, i32
  }
  func.func @transform_2(%arg0: i32) -> (i32, i32) {
    %c0_i32 = arith.constant 0 : i32
    %c0_i32_0 = arith.constant 0 : i32
    %c0_i32_1 = arith.constant 0 : i32
    return %c0_i32, %c0_i32_0 : i32, i32
  }
  func.func @transform_3(%arg0: i32) -> (i32, i32) {
    %c0_i32 = arith.constant 0 : i32
    %c0_i32_0 = arith.constant 0 : i32
    %c0_i32_1 = arith.constant 0 : i32
    return %c0_i32, %c0_i32_0 : i32, i32
  }
  func.func @transform_4(%arg0: i32) -> (i32, i32) {
    %c0_i32 = arith.constant 0 : i32
    %c0_i32_0 = arith.constant 0 : i32
    %c0_i32_1 = arith.constant 0 : i32
    return %c0_i32, %c0_i32_0 : i32, i32
  }
  func.func @transform_5(%arg0: i32) -> (i32, i32) {
    %c0_i32 = arith.constant 0 : i32
    %c0_i32_0 = arith.constant 0 : i32
    %c0_i32_1 = arith.constant 0 : i32
    return %c0_i32, %c0_i32_0 : i32, i32
  }
  func.func @transform_6(%arg0: i32) -> (i32, i32) {
    %c0_i32 = arith.constant 0 : i32
    %c0_i32_0 = arith.constant 0 : i32
    %c0_i32_1 = arith.constant 0 : i32
    return %c0_i32, %c0_i32_0 : i32, i32
  }
  func.func @transform_7(%arg0: i32) -> (i32, i32) {
    %c0_i32 = arith.constant 0 : i32
    %c0_i32_0 = arith.constant 0 : i32
    %c0_i32_1 = arith.constant 0 : i32
    return %c0_i32, %c0_i32_0 : i32, i32
  }
  func.func @transform_8(%arg0: i32) -> (i32, i32) {
    %c0_i32 = arith.constant 0 : i32
    %c0_i32_0 = arith.constant 0 : i32
    %c0_i32_1 = arith.constant 0 : i32
    return %c0_i32, %c0_i32_0 : i32, i32
  }
  func.func @transform_9(%arg0: i32) -> (i32, i32) {
    %c0_i32 = arith.constant 0 : i32
    %c0_i32_0 = arith.constant 0 : i32
    %c0_i32_1 = arith.constant 0 : i32
    return %c0_i32, %c0_i32_0 : i32, i32
  }
  func.func @transform_10(%arg0: i32) -> (i32, i32) {
    %c0_i32 = arith.constant 0 : i32
    %c0_i32_0 = arith.constant 0 : i32
    %c0_i32_1 = arith.constant 0 : i32
    return %c0_i32, %c0_i32_0 : i32, i32
  }
  func.func @transform_11(%arg0: i32) -> (i32, i32, i32) {
    %c0_i32 = arith.constant 0 : i32
    %c0_i32_0 = arith.constant 0 : i32
    %c0_i32_1 = arith.constant 0 : i32
    %c0_i32_2 = arith.constant 0 : i32
    return %c0_i32, %c0_i32_0, %c0_i32_1 : i32, i32, i32
  }
  func.func @transform_12(%arg0: i32) -> (i32, i32) {
    %c0_i32 = arith.constant 0 : i32
    %c0_i32_0 = arith.constant 0 : i32
    %c0_i32_1 = arith.constant 0 : i32
    return %c0_i32, %c0_i32_0 : i32, i32
  }
  func.func @transform_13(%arg0: i32) -> (i32, i32, i32) {
    %c0_i32 = arith.constant 0 : i32
    %c0_i32_0 = arith.constant 0 : i32
    %c0_i32_1 = arith.constant 0 : i32
    return %arg0, %c0_i32, %c0_i32_0 : i32, i32, i32
  }
}

</mosaic_0001>

<bundles_post_ra>
// kernel: salad_forward.1
= control target key start
LH: loop header
LB: loop body
LE: loop exit
PB: predicated region body
PF: predicated region fallthrough
CT: control target
= control target key end

     0   :  { %s2442_s0 = inlined_call_operand.vmem [shape: f32[2,16,32], index: 0, kind: input, shape index: {}]   ;;  %s2443_s1 = inlined_call_operand.vmem [shape: f32[2,1,32], index: 1, kind: input, shape index: {}]   ;;  %s2444_s2 = inlined_call_operand.vmem [shape: f32[32,128], index: 2, kind: input, shape index: {}]   ;;  %s2445_s3 = inlined_call_operand.vmem [shape: f32[1,128], index: 3, kind: input, shape index: {}]   ;;  %s2446_s4 = inlined_call_operand.vmem [shape: f32[128,32], index: 4, kind: input, shape index: {}]   ;;  %s2447_s5 = inlined_call_operand.vmem [shape: f32[1,32], index: 5, kind: input, shape index: {}]   ;;  %s2448_s6 = inlined_call_operand.hbm [shape: f32[32,64], index: 6, kind: input, shape index: {}]   ;;  %s2449_s7 = inlined_call_operand.vmem [shape: f32[1,64], index: 7, kind: input, shape index: {}]   ;;  %s2450_s8 = inlined_call_operand.vmem [shape: f32[64,160], index: 8, kind: input, shape index: {}]   ;;  %s2451_s9 = inlined_call_operand.vmem [shape: f32[1,160], index: 9, kind: input, shape index: {}]   ;;  %s2452_s10 = inlined_call_operand.vmem [shape: f32[1,32], index: 10, kind: input, shape index: {}]   ;;  %s2453_s11 = inlined_call_operand.hbm [shape: f32[2,32,160], index: 11, kind: input, shape index: {}]   ;;  %s2454_s12 = inlined_call_operand.hbm [shape: f32[160,160], index: 12, kind: input, shape index: {}]   ;;  %s2455_s13 = inlined_call_operand.vmem [shape: f32[2,1,160], index: 13, kind: output, shape index: {}]  }
   0x1   :  { %2460 = sst [smem:[#allocation10_spill]] %s2455_s13 }
   0x2   :  { %18 = vsyncpa [#allocation3], 0 }
   0x3   :  { %19 = vsyncpa [#allocation5], 0  ;;  %s2059_s25 = smov 0  }
   0x4 LB: > { %2461 = sst [smem:[#allocation9_spill]] %s1976_s25  ;;  %s1978_s26 = smov [#allocation4]   ;;  %s1976_s25 = sphi %s2059_s25, %s25_s25  }
   0x5   : > { %s388_s27 = sshll.u32 %s1978_s26, 4  ;;  %s2065_s28 = sadd.s32 4294967295, %s1976_s25   ;;  %s2074_s27 = int_to_ptr.vmem [resolvable:$true] %s388_s27 }
   0x6   : > { %p1545_p0 = scmp.ge.s32.totalorder %s1976_s25, 1  ;;  %p339_p1 = scmp.lt.s32.totalorder %s1976_s25, 3 }
   0x7   : > { %p2458_p2 = scmp.eq.s32.totalorder %s2065_s28, 0  ;;  %s1979_s30 = smov [#allocation2]  }
   0x8   : > { %p2070_p3 = pnand %p1545_p0, %p339_p1  ;;  %s363_s14 = sshll.u32 %s1979_s30, 4  ;;  %s2078_s14 = int_to_ptr.vmem [resolvable:$true] %s363_s14 }
   0x9   : > { %s1980_s16 = smov [#allocation6]   ;;  %s1878_s20 = scalar_lea.hbm %s2453_s11, 2048 }
   0xa   : > { %s2462_s29 = scalar_select %p2070_p3, 1, 0 }
   0xb   : > { %p1789_p4 = pneg %p2070_p3  ;;  %s2086_s17 = sshll.u32 %s1980_s16, 4  ;;  %s402_s17 = int_to_ptr.vmem [resolvable:$true] %s2086_s17 }
   0xc   : > { %p1879_p6 = scmp.ne.s32.totalorder %s2453_s11, %s1878_s20  ;;  %p1885_p10 = scmp.lt.u32.totalorder %s1878_s20, %s2453_s11 }
   0xd   : > { %p2082_p5 = pnand %p2458_p2, %p1789_p4 }
   0xf   : > { %p2096_p7 = pneg %p2082_p5 }
  0x11   : > { %p1881_p8 = pnand %p2096_p7, %p1879_p6 }
  0x13   : > { %p1882_p9 = pneg %p1881_p8 }
  0x15   : > { %p1887_p11 = pnand %p1885_p10, %p1882_p9 }
  0x17   : > { %1890 = shalt.err (!%p1887_p11)
}
  0x18   : > { %s1891_s30 = scalar_lea.vmem %s2074_s27, 2048  ;;  %p1899_p1 = scmp.lt.s32.totalorder %s2074_s27, %s2074_s27 }
  0x19   : > { %p1892_p12 = scmp.ne.s32.totalorder %s2074_s27, %s1891_s30  ;;  %p1900_p4 = scmp.lt.s32.totalorder %s1891_s30, %s1891_s30 }
  0x1b   : > { %p1894_p13 = pnand %p1892_p12, %p2096_p7  ;;  %p1901_p6 = por %p1900_p4, %p1899_p1 }
  0x1d   : > { %p1895_p0 = pneg %p1894_p13 }
  0x1f   : > { %p1902_p8 = pnand %p1901_p6, %p1895_p0 }
  0x21   : > { %1905 = shalt.err (!%p1902_p8)
}
  0x22   : > { %s2457_s16 = smov 256   ;;  %s1982_s18 = smov 16  }
  0x23   : > { %1795 = dma.hbm_to_vmem [thread:$0]  (!%p2082_p5), %s2453_s11, 2048, %s2074_s27, [#allocation5], %s2457_s16, %s2457_s16, %s1982_s18  }
  0x24   : > { %s1906_s24 = scalar_lea.hbm %s2448_s6, 512 }
  0x25   : > { %p1907_p9 = scmp.ne.s32.totalorder %s2448_s6, %s1906_s24  ;;  %p1913_p12 = scmp.lt.u32.totalorder %s1906_s24, %s2448_s6 }
  0x27   : > { %p1909_p10 = pnand %p1907_p9, %p2096_p7 }
  0x29   : > { %p1910_p11 = pneg %p1909_p10 }
  0x2b   : > { %p1915_p13 = pnand %p1913_p12, %p1910_p11 }
  0x2d   : > { %1918 = shalt.err (!%p1915_p13)
}
  0x2e   : > { %s1919_s27 = scalar_lea.vmem %s2078_s14, 512  ;;  %p1927_p6 = scmp.lt.s32.totalorder %s2078_s14, %s2078_s14 }
  0x2f   : > { %p1920_p0 = scmp.ne.s32.totalorder %s2078_s14, %s1919_s27  ;;  %p1928_p8 = scmp.lt.s32.totalorder %s1919_s27, %s1919_s27 }
  0x31   : > { %p1922_p1 = pnand %p1920_p0, %p2096_p7  ;;  %p1929_p9 = por %p1928_p8, %p1927_p6 }
  0x33   : > { %p1923_p4 = pneg %p1922_p1 }
  0x35   : > { %p1930_p10 = pnand %p1929_p9, %p1923_p4 }
  0x37   : > { %1933 = shalt.err (!%p1930_p10)
}
  0x38   : > { %s1983_s19 = smov 128   ;;  %s1984_s13 = smov 8  }
  0x39   : > { %1792 = dma.hbm_to_vmem [thread:$0]  (!%p2082_p5), %s2448_s6, 512, %s2078_s14, [#allocation3], %s1983_s19, %s1983_s19, %s1984_s13  }
  0x3a   : > { %s1934_s24 = scalar_lea.hbm %s2454_s12, 5120 }
  0x3b   : > { %p1935_p11 = scmp.ne.s32.totalorder %s2454_s12, %s1934_s24  ;;  %p1941_p0 = scmp.lt.u32.totalorder %s1934_s24, %s2454_s12 }
  0x3d   : > { %p1937_p12 = pnand %p1935_p11, %p2096_p7 }
  0x3f   : > { %p1938_p13 = pneg %p1937_p12 }
  0x41   : > { %p1943_p1 = pnand %p1941_p0, %p1938_p13 }
  0x43   : > { %1946 = shalt.err (!%p1943_p1)
}
  0x44   : > { %s1947_s25 = scalar_lea.vmem %s402_s17, 5120  ;;  %p1955_p9 = scmp.lt.s32.totalorder %s402_s17, %s402_s17 }
  0x45   : > { %p1948_p4 = scmp.ne.s32.totalorder %s402_s17, %s1947_s25  ;;  %p1956_p10 = scmp.lt.s32.totalorder %s1947_s25, %s1947_s25 }
  0x47   : > { %p1950_p6 = pnand %p1948_p4, %p2096_p7  ;;  %p1957_p2 = por %p1956_p10, %p1955_p9 }
  0x49   : > { %p1951_p8 = pneg %p1950_p6 }
  0x4b   : > { %p1958_p3 = pnand %p1957_p2, %p1951_p8 }
  0x4d   : > { %1961 = shalt.err (!%p1958_p3)
}
  0x4e   : > { %s2465_s14 = smov 256   ;;  %p2466_p11 = scmp.ne.s32.totalorder %s2462_s29, 0 }
  0x4f   : > { %1798 = dma.hbm_to_vmem [thread:$0]  (!%p2082_p5), %s2454_s12, 5120, %s402_s17, [#allocation5], %s2465_s14, %s2465_s14, %s1982_s18  }
  0x50   : > { %431 = sbr.rel (%p2466_p11) target bundleno = 2353 (0x931), region = 72  ;;  %p2467_p7 = scmp.eq.s32.totalorder (!%p2466_p11), %s2065_s28, 0 }
  0x57   : > { %1967 = dma.done.wait (%p2467_p7), [#allocation3], 512   ;;  %p2468_p12 = pmov %p2467_p7 }
  0x58   : > { %p2469_p2 = pmov %p2467_p7 }
  0x59   : > { %1969 = vsyncadd (%p2468_p12), [#allocation3], 4294966784 }
  0x5a   : > { %1971 = dma.done.wait (%p2469_p2), [#allocation5], 7168   ;;  %p2470_p3 = pmov %p2469_p2 }
  0x5b   : > { %p485_p13 = scmp.lt.s32.totalorder %s2065_s28, 1  ;;  %vm511_vm0 = vcmask 261120   ;;  %v500_v0 = vld [vmem:[%s2444_s2] sm:$0xff]  ;;  %v501_v1 = vld [vmem:[%s2444_s2 + $0x8] sm:$0xff]  ;;  %v502_v2 = vld [vmem:[%s2444_s2 + $0x10] sm:$0xff]  ;;  %v1985_v35 = vmov 0.0|0.0  }
  0x5c   : > { %1973 = vsyncadd (%p2470_p3), [#allocation5], 4294960128  ;;  %v1659_v3 = vpack.c.bf16 %v501_v1, %v500_v0  ;;  %v503_v4 = vld [vmem:[%s2444_s2 + $0x18] sm:$0xff]  ;;  %v595_v7 = vld [vmem:[%s2446_s4] sm:$0xff]  ;;  %vm1986_vm1 = vmmov 0   ;;  %v1987_v38 = vmov 0.0  }
  0x5d   : > { %s2474_s28 = smov (!%p485_p13, %s2065_s28), 1  ;;  %v1663_v6 = vpack.c.bf16 %v503_v4, %v502_v2  ;;  %v596_v8 = vld [vmem:[%s2446_s4 + $0x8] sm:$0xff]  ;;  %v597_v9 = vld [vmem:[%s2446_s4 + $0x10] sm:$0xff]  ;;  %v598_v11 = vld [vmem:[%s2446_s4 + $0x18] sm:$0xff]  ;;  %vm800_vm2 = vcmask 523264   ;;  %vm1403_vm3 = vcmask 1040384  }
  0x5e   : > { %s1572_s29 = sshll.u32 %s2474_s28, 4  ;;  %1660 = vmatprep.subr.bf16.mxu0 %v1659_v3  ;;  %v1667_v10 = vpack.c.bf16 %v596_v8, %v595_v7  ;;  %v1671_v12 = vpack.c.bf16 %v598_v11, %v597_v9  ;;  %v599_v13 = vld [vmem:[%s2446_s4 + $0x20] sm:$0xff]  ;;  %v600_v14 = vld [vmem:[%s2446_s4 + $0x28] sm:$0xff]  ;;  %v601_v17 = vld [vmem:[%s2446_s4 + $0x30] sm:$0xff]  ;;  %s492_s25 = scalar_lea.vmem %s2443_s1, %s2474_s28  ;;  %vm1405_vm4 = vcmask 253952  }
  0x5f   : > { %s489_s23 = scalar_lea.vmem %s2442_s0, %s1572_s29  ;;  %1662 = vmatpush3.bf16.msra.mxu0 %v1659_v3  ;;  %v1675_v15 = vpack.c.bf16 %v600_v14, %v599_v13  ;;  %v602_v18 = vld [vmem:[%s2446_s4 + $0x38] sm:$0xff]  ;;  %v603_v20 = vld [vmem:[%s2446_s4 + $0x40] sm:$0xff]  ;;  %v604_v21 = vld [vmem:[%s2446_s4 + $0x48] sm:$0xff]  ;;  %s1556_s13 = sshll.u32 %s2474_s28, 1 }
  0x60   : > { %v497_v5 = vld [vmem:[%s489_s23] sm:$0xff]  ;;  %1664 = vmatprep.subr.bf16.mxu0 %v1663_v6  ;;  %1668 = vmatprep.subr.bf16.mxu1 %v1667_v10  ;;  %v498_v16 = vld [vmem:[%s489_s23 + $0x8] sm:$0xff]  ;;  %v1679_v19 = vpack.c.bf16 %v602_v18, %v601_v17  ;;  %v1683_v22 = vpack.c.bf16 %v604_v21, %v603_v20  ;;  %v605_v23 = vld [vmem:[%s2446_s4 + $0x50] sm:$0xff]  ;;  %s2471_s22 = sld [smem:[#allocation10_spill]] }
  0x61   : > { %1610 = vmatprep.mubr.msk.f32.mxu0 %vm511_vm0, %v497_v5  ;;  %1670 = vmatpush3.bf16.msra.mxu1 %v1667_v10  ;;  %v606_v24 = vld [vmem:[%s2446_s4 + $0x58] sm:$0xff]  ;;  %v607_v26 = vld [vmem:[%s2446_s4 + $0x60] sm:$0xff]  ;;  %v608_v27 = vld [vmem:[%s2446_s4 + $0x68] sm:$0xff] }
  0x62   : > { %1672 = vmatprep.subr.bf16.mxu1 %v1671_v12  ;;  %v1687_v25 = vpack.c.bf16 %v606_v24, %v605_v23  ;;  %v1691_v28 = vpack.c.bf16 %v608_v27, %v607_v26  ;;  %v609_v29 = vld [vmem:[%s2446_s4 + $0x70] sm:$0xff]  ;;  %v610_v30 = vld [vmem:[%s2446_s4 + $0x78] sm:$0xff]  ;;  %v693_v32 = vld [vmem:[#allocation2] sm:$0xff] }
  0x63   : > { %1666 = vmatpush3.bf16.msra.mxu0 %v1663_v6  ;;  %v1695_v31 = vpack.c.bf16 %v610_v30, %v609_v29  ;;  %v694_v33 = vld [vmem:[#allocation2 + $0x8] sm:$0xff]  ;;  %v695_v34 = vld [vmem:[#allocation2 + $0x10] sm:$0xff]  ;;  %v696_v37 = vld [vmem:[#allocation2 + $0x18] sm:$0xff] }
  0x64   : > { %1699 = vmatprep.subr.bf16.mxu0 %v1985_v35  ;;  %v1700_v36 = vpack.c.bf16 %v694_v33, %v693_v32  ;;  %v1077_v39 = vld [vmem:[#allocation4 + $0x8] sm:$0xff]  ;;  %v1079_v40 = vld [vmem:[#allocation4 + $0x18] sm:$0xff]  ;;  %v1703_v41 = vpack.c.bf16 %v696_v37, %v695_v34  ;;  %v1076_v43 = vld [vmem:[#allocation4] sm:$0xff] }
  0x65   : > { %1674 = vmatpush3.bf16.msra.mxu1 %v1671_v12  ;;  %v1721_v42 = vpack.c.bf16 %v1079_v40, %v1077_v39  ;;  %v1078_v44 = vld [vmem:[#allocation4 + $0x10] sm:$0xff]  ;;  %v499_v45 = vld [vmem:[%s492_s25] sm:$0x1]  ;;  %v1081_v54 = vld [vmem:[#allocation4 + $0x28] sm:$0xff] }
  0x66   : > { %1611 = vmatmul.mubr.msk.f32.vlgmr.msra.gmra.mrb[0].mxu0 %vm511_vm0, %v498_v16  ;;  %1676 = vmatprep.subr.bf16.mxu1 %v1675_v15  ;;  %v1723_v46 = vpack.c.bf16 %v1078_v44, %v1076_v43  ;;  %v1557_v47 = vld [vmem:[%s2445_s3] ss:$0 sm:$0xff]  ;;  %v1083_v55 = vld [vmem:[#allocation4 + $0x38] sm:$0xff]  ;;  %v1082_v58 = vld [vmem:[#allocation4 + $0x30] sm:$0xff]  ;;  %s496_s24 = scalar_lea.vmem %s2471_s22, %s1556_s13 }
  0x67   : > { %1656 = vmatprep.mubr.msk.f32.mxu0 %vm1986_vm1, %v1987_v38  ;;  %1701 = vmatpush3.bf16.msra.mxu0 %v1700_v36  ;;  %v1725_v56 = vpack.c.bf16 %v1083_v55, %v1081_v54  ;;  %v1080_v57 = vld [vmem:[#allocation4 + $0x20] sm:$0xff] }
  0x68   : > { %1702 = vmatprep.subr.bf16.mxu0 %v1985_v35  ;;  %v1727_v59 = vpack.c.bf16 %v1082_v58, %v1080_v57  ;;  %v1560_v60 = vld [vmem:[%s2447_s5] ss:$0 sm:$0xff] }
  0x69   : > { %1678 = vmatpush3.bf16.msra.mxu1 %v1675_v15  ;;  %v2282_v29 = vld [vmem:[%s2452_s10] sm:$0x1] }
  0x6a   : > { %1680 = vmatprep.subr.bf16.mxu1 %v1679_v19 }
  0x6b   : > { %1704 = vmatpush3.bf16.msra.mxu0 %v1703_v41 }
  0x6c   : > { %1722 = vmatprep.subr.bf16.mxu0 %v1721_v42 }
  0x6d   : > { %1682 = vmatpush3.bf16.msra.mxu1 %v1679_v19 }
  0x6e   : > { %1684 = vmatprep.subr.bf16.mxu1 %v1683_v22  ;;  %1657 = vmatmul.mubr.msk.f32.vlgmr.msra.gmra.mrb[2].mxu0 %vm511_vm0, %v499_v45 }
  0x6f   : > { %1724 = vmatpush1.bf16.msra.mxu0 %v1723_v46  ;;  %1154 = vmatprep.mubr.f32.mxu0 %v1987_v38 }
  0x70   : > { %1726 = vmatprep.subr.bf16.mxu0 %v1725_v56 }
  0x71   : > { %1686 = vmatpush3.bf16.msra.mxu1 %v1683_v22 }
  0x72   : > { %1688 = vmatprep.subr.bf16.mxu1 %v1687_v25 }
  0x73   : > { %1728 = vmatpush1.bf16.msra.mxu0 %v1727_v59 }
  0x75   : > { %1690 = vmatpush3.bf16.msra.mxu1 %v1687_v25  ;;  %v790_v25 = vlaneseq }
  0x76   : > { %1692 = vmatprep.subr.bf16.mxu1 %v1691_v28 }
  0x77   : > { %v2277_v26 = vshrl.u32 %v790_v25, 7  ;;  %vm1447_vm5 = vcmp.lt.s32.totalorder %v790_v25, 160 }
  0x79   : > { %1694 = vmatpush3.bf16.msra.mxu1 %v1691_v28  ;;  %v2285_v30 = vsub.s32 0, %v2277_v26 }
  0x7a   : > { %1696 = vmatprep.subr.bf16.mxu1 %v1695_v31 }
  0x7d   : > { %1698 = vmatpush3.bf16.msra.mxu1 %v1695_v31 }
 0x139   : > { %v1612_v48 = vpop.f32.mrb[0].mxu0 }
 0x13a   : > { %v590_v49 = vadd.f32 %v1612_v48, %v1557_v47  ;;  %v584_v50 = vpop.f32.mrb[1].mxu0 }
 0x13b   : > { %v585_v51 = vadd.f32 %v1557_v47, %v584_v50 }
 0x13c   : > { %v594_v53 = vmax.f32 %v590_v49, 0.0 }
 0x13d   : > { %v593_v52 = vmax.f32 %v585_v51, 0.0 }
 0x13f   : > { %1645 = vmatprep.mubr.f32.mxu1 %v593_v52 }
 0x140   : > { %1646 = vmatmul.mubr.f32.vlgmr.msra.gmra.mrb[0].mxu1 %v594_v53 }
 0x141   : > { %868 = vmatprep.mubr.f32.mxu1 %v1987_v38  ;;  %v2293_v39 = vpop.f32.mrb[2].mxu0 }
 0x142   : > { %v1658_v40 = vpop.f32.mrb[3].mxu0 }
 0x213   : > { %v1647_v61 = vpop.f32.mrb[0].mxu1 }
 0x214   : > { %v2259_v62 = vadd.f32 %v1647_v61, %v1560_v60  ;;  %v684_v63 = vpop.f32.mrb[1].mxu1 }
 0x215   : > { %v2261_v0 = vadd.f32 %v1560_v60, %v684_v63 }
 0x216   : > { %v879_v1 = vsel %vm511_vm0, %v2259_v62, -inf }
 0x217   : > { %1565 = vmatmul.mubr.msk.f32.vlgmr.msra.gmra.mrb[4].mxu0 %vm511_vm0, %v2261_v0  ;;  %v878_v2 = vsel %vm511_vm0, %v2261_v0, -inf }
 0x218   : > { %1160 = vmatprep.mubr.f32.mxu0 %v1987_v38  ;;  %v880_v3 = vmax.f32 %v878_v2, %v879_v1 }
 0x21a   : > { %v881_v4 = vrot.slane %v880_v3, 4 }
 0x21b   : > { %1566 = vmatmul.mubr.msk.f32.gmra.mrb[6].mxu0 %vm511_vm0, %v2259_v62 }
 0x21c   : > { %v882_v5 = vmax.f32 %v880_v3, %v881_v4 }
 0x21e   : > { %v883_v6 = vrot.slane %v882_v5, 2 }
 0x220   : > { %v884_v7 = vmax.f32 %v882_v5, %v883_v6 }
 0x222   : > { %v885_v8 = vrot.slane %v884_v7, 1 }
 0x224   : > { %v886_v9 = vmax.f32 %v884_v7, %v885_v8 }
 0x226   : > { %v887_v10 = vsub.f32 %v2261_v0, %v886_v9  ;;  %v888_v11 = vsub.f32 %v2259_v62, %v886_v9 }
 0x228   : > { %v889_v12 = vmul.f32 1.442695, %v887_v10  ;;  %v891_v13 = vmul.f32 1.442695, %v888_v11 }
 0x22a   : > { %1824 = vpow2.f32 %v889_v12 }
 0x22b   : > { %1826 = vpow2.f32 %v891_v13 }
 0x234   : > { %v1825_v14 = vpop.eup %1824 }
 0x235   : > { %v1827_v15 = vpop.eup %1826  ;;  %v893_v16 = vsel %vm511_vm0, %v1825_v14, 0.0 }
 0x236   : > { %v894_v17 = vsel %vm511_vm0, %v1827_v15, 0.0 }
 0x237   : > { %v895_v18 = vadd.f32 %v894_v17, %v893_v16 }
 0x239   : > { %v896_v19 = vrot.slane %v895_v18, 4 }
 0x23b   : > { %v897_v20 = vadd.f32 %v896_v19, %v895_v18 }
 0x23d   : > { %v898_v21 = vrot.slane %v897_v20, 2 }
 0x23f   : > { %v899_v22 = vadd.f32 %v898_v21, %v897_v20 }
 0x241   : > { %v900_v23 = vrot.slane %v899_v22, 1 }
 0x243   : > { %v901_v24 = vadd.f32 %v900_v23, %v899_v22 }
 0x245   : > { %1828 = vlog2.f32 %v901_v24 }
 0x24f   : > { %v1829_v27 = vpop.eup %1828 }
 0x250   : > { %v903_v28 = vmul.f32 0.6931472, %v1829_v27 }
 0x252   : > { %v904_v31 = vadd.f32 %v903_v28, %v886_v9 }
 0x254   : > { %v905_v32 = vsub.f32 %v2282_v29, %v904_v31 }
 0x256   : > { %v910_v33 = vrot.slane %v905_v32, %v2285_v30 }
 0x258   : > { %v912_v34 = vadd.f32 %v910_v33, %v2261_v0  ;;  %v913_v36 = vadd.f32 %v910_v33, %v2259_v62 }
 0x25a   : > { %v914_v35 = vsel %vm511_vm0, %v912_v34, -inf  ;;  %v917_v37 = vsel %vm511_vm0, %v913_v36, -inf }
 0x25b   : > { %915 = vmax.xlane.f32.xlu0 %v914_v35 }
 0x25f   : > { %918 = vmax.xlane.f32.xlu0 %v917_v37 }
 0x2e8   : > { %v916_v41 = vpop.xlane.xlu0 %915 }
 0x2e9   : > { %v920_v42 = vsub.f32 %v912_v34, %v916_v41 }
 0x2ea   : > { %v2295_v43 = vpop.f32.mrb[4].mxu0 }
 0x2eb   : > { %v922_v44 = vmul.f32 1.442695, %v920_v42  ;;  %v2297_v45 = vpop.f32.mrb[5].mxu0 }
 0x2ec   : > { %v919_v46 = vpop.xlane.xlu0 %918 }
 0x2ed   : > { %1830 = vpow2.f32 %v922_v44  ;;  %v921_v47 = vsub.f32 %v913_v36, %v919_v46 }
 0x2ee   : > { %v2299_v48 = vpop.f32.mrb[6].mxu0 }
 0x2ef   : > { %v924_v49 = vmul.f32 1.442695, %v921_v47  ;;  %v2301_v50 = vpop.f32.mrb[7].mxu0 }
 0x2f1   : > { %1832 = vpow2.f32 %v924_v49 }
 0x2f7   : > { %v1831_v51 = vpop.eup %1830 }
 0x2f8   : > { %v926_v52 = vsel %vm511_vm0, %v1831_v51, 0.0 }
 0x2f9   : > { %927 = vadd.xlane.f32.xlu1 %v926_v52 }
 0x2fb   : > { %v1833_v53 = vpop.eup %1832 }
 0x2fc   : > { %v929_v54 = vsel %vm511_vm0, %v1833_v53, 0.0 }
 0x2fd   : > { %930 = vadd.xlane.f32.xlu1 %v929_v54 }
 0x386   : > { %v928_v55 = vpop.xlane.xlu1 %927 }
 0x387   : > { %1834 = vlog2.f32 %v928_v55 }
 0x38a   : > { %v931_v56 = vpop.xlane.xlu1 %930 }
 0x38b   : > { %1836 = vlog2.f32 %v931_v56 }
 0x391   : > { %v1835_v57 = vpop.eup %1834 }
 0x392   : > { %v933_v58 = vmul.f32 0.6931472, %v1835_v57 }
 0x394   : > { %v936_v59 = vadd.f32 %v933_v58, %v916_v41 }
 0x395   : > { %v1837_v60 = vpop.eup %1836 }
 0x396   : > { %v938_v61 = vsub.f32 -3.1780539, %v936_v59  ;;  %v935_v63 = vmul.f32 0.6931472, %v1837_v60 }
 0x398   : > { %v937_v1 = vadd.f32 %v935_v63, %v919_v46  ;;  %v940_v2 = vadd.f32 %v938_v61, %v2261_v0 }
 0x39a   : > { %v939_v3 = vsub.f32 -3.1780539, %v937_v1  ;;  %v942_v5 = vsel %vm511_vm0, %v940_v2, -inf }
 0x39c   : > { %v941_v4 = vadd.f32 %v939_v3, %v2259_v62 }
 0x39e   : > { %v943_v6 = vsel %vm511_vm0, %v941_v4, -inf }
 0x39f   : > { %v944_v7 = vmax.f32 %v942_v5, %v943_v6 }
 0x3a1   : > { %v945_v8 = vrot.slane %v944_v7, 4 }
 0x3a3   : > { %v946_v9 = vmax.f32 %v944_v7, %v945_v8 }
 0x3a5   : > { %v947_v10 = vrot.slane %v946_v9, 2 }
 0x3a7   : > { %v948_v11 = vmax.f32 %v946_v9, %v947_v10 }
 0x3a9   : > { %v949_v12 = vrot.slane %v948_v11, 1 }
 0x3ab   : > { %v950_v13 = vmax.f32 %v948_v11, %v949_v12 }
 0x3ad   : > { %v951_v14 = vsub.f32 %v940_v2, %v950_v13  ;;  %v952_v15 = vsub.f32 %v941_v4, %v950_v13 }
 0x3af   : > { %v953_v16 = vmul.f32 1.442695, %v951_v14  ;;  %v955_v17 = vmul.f32 1.442695, %v952_v15 }
 0x3b1   : > { %1838 = vpow2.f32 %v953_v16 }
 0x3b2   : > { %1840 = vpow2.f32 %v955_v17 }
 0x3bb   : > { %v1839_v18 = vpop.eup %1838 }
 0x3bc   : > { %v1841_v19 = vpop.eup %1840  ;;  %v957_v20 = vsel %vm511_vm0, %v1839_v18, 0.0 }
 0x3bd   : > { %v958_v21 = vsel %vm511_vm0, %v1841_v19, 0.0 }
 0x3be   : > { %v959_v22 = vadd.f32 %v958_v21, %v957_v20 }
 0x3c0   : > { %v960_v23 = vrot.slane %v959_v22, 4 }
 0x3c2   : > { %v961_v24 = vadd.f32 %v960_v23, %v959_v22 }
 0x3c4   : > { %v962_v27 = vrot.slane %v961_v24, 2 }
 0x3c6   : > { %v963_v28 = vadd.f32 %v962_v27, %v961_v24 }
 0x3c8   : > { %v964_v31 = vrot.slane %v963_v28, 1 }
 0x3ca   : > { %v965_v32 = vadd.f32 %v964_v31, %v963_v28 }
 0x3cc   : > { %1842 = vlog2.f32 %v965_v32 }
 0x3d6   : > { %v1843_v33 = vpop.eup %1842 }
 0x3d7   : > { %v967_v34 = vmul.f32 0.6931472, %v1843_v33 }
 0x3d9   : > { %v968_v35 = vadd.f32 %v967_v34, %v950_v13 }
 0x3db   : > { %v969_v36 = vsub.f32 %v2282_v29, %v968_v35 }
 0x3dd   : > { %v974_v37 = vrot.slane %v969_v36, %v2285_v30 }
 0x3df   : > { %v977_v40 = vadd.f32 %v974_v37, %v2259_v62  ;;  %v976_v41 = vadd.f32 %v974_v37, %v2261_v0 }
 0x3e1   : > { %v981_v42 = vsel %vm511_vm0, %v977_v40, -inf  ;;  %v978_v44 = vsel %vm511_vm0, %v976_v41, -inf }
 0x3e2   : > { %982 = vmax.xlane.f32.xlu1 %v981_v42  ;;  %979 = vmax.xlane.f32.xlu0 %v978_v44 }
 0x46f   : > { %v983_v46 = vpop.xlane.xlu1 %982  ;;  %v980_v47 = vpop.xlane.xlu0 %979 }
 0x470   : > { %v985_v49 = vsub.f32 %v977_v40, %v983_v46  ;;  %v984_v51 = vsub.f32 %v976_v41, %v980_v47 }
 0x472   : > { %v988_v52 = vmul.f32 1.442695, %v985_v49  ;;  %v986_v53 = vmul.f32 1.442695, %v984_v51 }
 0x474   : > { %1844 = vpow2.f32 %v988_v52  ;;  %v774_v52 = vld [vmem:[%s2450_s8 + $0x10] sm:$0xff] }
 0x475   : > { %1846 = vpow2.f32 %v986_v53  ;;  %v777_v53 = vld [vmem:[%s2450_s8 + $0x28] sm:$0xff] }
 0x47e   : > { %v1845_v54 = vpop.eup %1844 }
 0x47f   : > { %v1847_v55 = vpop.eup %1846  ;;  %v993_v56 = vsel %vm511_vm0, %v1845_v54, 0.0  ;;  %v779_v54 = vld [vmem:[%s2450_s8 + $0x38] sm:$0xff] }
 0x480   : > { %994 = vadd.xlane.f32.xlu1 %v993_v56  ;;  %v990_v57 = vsel %vm511_vm0, %v1847_v55, 0.0  ;;  %v1709_v56 = vpack.c.bf16 %v779_v54, %v777_v53 }
 0x481   : > { %991 = vadd.xlane.f32.xlu0 %v990_v57  ;;  %v776_v57 = vld [vmem:[%s2450_s8 + $0x20] sm:$0xff] }
 0x50d   : > { %v995_v58 = vpop.xlane.xlu1 %994 }
 0x50e   : > { %1848 = vlog2.f32 %v995_v58  ;;  %v992_v59 = vpop.xlane.xlu0 %991  ;;  %v778_v58 = vld [vmem:[%s2450_s8 + $0x30] sm:$0xff] }
 0x50f   : > { %1850 = vlog2.f32 %v992_v59  ;;  %v781_v59 = vld [vmem:[%s2450_s8 + $0x48] sm:$0xff] }
 0x518   : > { %v1849_v60 = vpop.eup %1848 }
 0x519   : > { %v1851_v61 = vpop.eup %1850  ;;  %v999_v63 = vmul.f32 0.6931472, %v1849_v60  ;;  %v783_v60 = vld [vmem:[%s2450_s8 + $0x58] sm:$0xff] }
 0x51a   : > { %v997_v1 = vmul.f32 0.6931472, %v1851_v61  ;;  %v1711_v61 = vpack.c.bf16 %v778_v58, %v776_v57  ;;  %v1281_v57 = vld [vmem:[#allocation6] sm:$0xff] }
 0x51b   : > { %v1001_v2 = vadd.f32 %v999_v63, %v983_v46  ;;  %v1713_v63 = vpack.c.bf16 %v783_v60, %v781_v59  ;;  %v1283_v59 = vld [vmem:[#allocation6 + $0x10] sm:$0xff]  ;;  %v1286_v60 = vld [vmem:[#allocation6 + $0x28] sm:$0xff] }
 0x51c   : > { %v1000_v3 = vadd.f32 %v997_v1, %v980_v47  ;;  %v697_v1 = vld [vmem:[%s2449_s7] sm:$0x1] }
 0x51d   : > { %v1003_v4 = vsub.f32 -3.1780539, %v1001_v2  ;;  %v780_v2 = vld [vmem:[%s2450_s8 + $0x40] sm:$0xff] }
 0x51e   : > { %v1002_v5 = vsub.f32 -3.1780539, %v1000_v3  ;;  %v782_v3 = vld [vmem:[%s2450_s8 + $0x50] sm:$0xff] }
 0x51f   : > { %v1005_v6 = vadd.f32 %v1003_v4, %v2259_v62  ;;  %v1715_v4 = vpack.c.bf16 %v782_v3, %v780_v2  ;;  %v1285_v2 = vld [vmem:[#allocation6 + $0x20] sm:$0xff]  ;;  %v1287_v3 = vld [vmem:[#allocation6 + $0x30] sm:$0xff] }
 0x520   : > { %v1004_v7 = vadd.f32 %v1002_v5, %v2261_v0  ;;  %v768_v5 = vadd.f32 %v2293_v39, %v697_v1 }
 0x521   : > { %v1007_v8 = vsel %vm511_vm0, %v1005_v6, -inf }
 0x522   : > { %v1006_v9 = vsel %vm511_vm0, %v1004_v7, -inf  ;;  %v771_v39 = vmax.f32 %v768_v5, 0.0  ;;  %v1292_v5 = vld [vmem:[#allocation6 + $0x58] sm:$0xff] }
 0x523   : > { %v1008_v10 = vmax.f32 %v1006_v9, %v1007_v8  ;;  %v784_v8 = vld [vmem:[%s2450_s8 + $0x60] sm:$0xff] }
 0x525   : > { %v1009_v11 = vrot.slane %v1008_v10, 4 }
 0x527   : > { %v1010_v12 = vmax.f32 %v1008_v10, %v1009_v11  ;;  %v786_v10 = vld [vmem:[%s2450_s8 + $0x70] sm:$0xff] }
 0x528   : > { %v1719_v11 = vpack.c.bf16 %v786_v10, %v784_v8  ;;  %v1289_v8 = vld [vmem:[#allocation6 + $0x40] sm:$0xff]  ;;  %v1294_v10 = vld [vmem:[#allocation6 + $0x68] sm:$0xff] }
 0x529   : > { %v1011_v13 = vrot.slane %v1010_v12, 2 }
 0x52b   : > { %v1012_v14 = vmax.f32 %v1010_v12, %v1011_v13 }
 0x52d   : > { %v1013_v15 = vrot.slane %v1012_v14, 1 }
 0x52f   : > { %v1014_v16 = vmax.f32 %v1012_v14, %v1013_v15 }
 0x531   : > { %v1015_v17 = vsub.f32 %v1004_v7, %v1014_v16  ;;  %v1016_v18 = vsub.f32 %v1005_v6, %v1014_v16  ;;  %v785_v6 = vld [vmem:[%s2450_s8 + $0x68] sm:$0xff]  ;;  %v787_v7 = vld [vmem:[%s2450_s8 + $0x78] sm:$0xff] }
 0x532   : > { %v1717_v9 = vpack.c.bf16 %v787_v7, %v785_v6  ;;  %v1743_v6 = vpack.c.bf16 %v1287_v3, %v1285_v2  ;;  %v1314_v3 = vld [vmem:[#allocation6 + $0x108] sm:$0xff] }
 0x533   : > { %v1017_v19 = vmul.f32 1.442695, %v1015_v17  ;;  %v1019_v20 = vmul.f32 1.442695, %v1016_v18 }
 0x535   : > { %1852 = vpow2.f32 %v1017_v19 }
 0x536   : > { %1854 = vpow2.f32 %v1019_v20 }
 0x53f   : > { %v1853_v21 = vpop.eup %1852 }
 0x540   : > { %v1855_v22 = vpop.eup %1854  ;;  %v1021_v23 = vsel %vm511_vm0, %v1853_v21, 0.0 }
 0x541   : > { %v1022_v24 = vsel %vm511_vm0, %v1855_v22, 0.0  ;;  %v1169_v22 = vld [vmem:[#allocation4 + $0x48] sm:$0xff] }
 0x542   : > { %v1023_v27 = vadd.f32 %v1022_v24, %v1021_v23  ;;  %v1171_v23 = vld [vmem:[#allocation4 + $0x58] sm:$0xff]  ;;  %v1168_v24 = vld [vmem:[#allocation4 + $0x40] sm:$0xff] }
 0x544   : > { %v1024_v28 = vrot.slane %v1023_v27, 4 }
 0x546   : > { %v1025_v31 = vadd.f32 %v1024_v28, %v1023_v27  ;;  %v1729_v27 = vpack.c.bf16 %v1171_v23, %v1169_v22  ;;  %v1170_v28 = vld [vmem:[#allocation4 + $0x50] sm:$0xff] }
 0x548   : > { %v1026_v32 = vrot.slane %v1025_v31, 2 }
 0x54a   : > { %v1027_v33 = vadd.f32 %v1026_v32, %v1025_v31  ;;  %v1173_v31 = vld [vmem:[#allocation4 + $0x68] sm:$0xff]  ;;  %v1175_v32 = vld [vmem:[#allocation4 + $0x78] sm:$0xff] }
 0x54c   : > { %v1028_v34 = vrot.slane %v1027_v33, 1 }
 0x54e   : > { %v1029_v35 = vadd.f32 %v1028_v34, %v1027_v33  ;;  %v1731_v33 = vpack.c.bf16 %v1170_v28, %v1168_v24  ;;  %v1733_v34 = vpack.c.bf16 %v1175_v32, %v1173_v31 }
 0x550   : > { %1856 = vlog2.f32 %v1029_v35  ;;  %v1172_v35 = vld [vmem:[#allocation4 + $0x60] sm:$0xff] }
 0x55a   : > { %v1857_v36 = vpop.eup %1856 }
 0x55b   : > { %v1031_v37 = vmul.f32 0.6931472, %v1857_v36  ;;  %v1174_v36 = vld [vmem:[#allocation4 + $0x70] sm:$0xff] }
 0x55d   : > { %v1032_v40 = vadd.f32 %v1031_v37, %v1014_v16  ;;  %v1735_v37 = vpack.c.bf16 %v1174_v36, %v1172_v35 }
 0x55f   : > { %v1033_v41 = vsub.f32 %v2282_v29, %v1032_v40  ;;  %v773_v29 = vld [vmem:[%s2450_s8 + $0x8] sm:$0xff]  ;;  %v788_v40 = vld [vmem:[%s2451_s9] sm:$0x3] }
 0x561   : > { %v1038_v42 = vrot.slane %v1033_v41, %v2285_v30  ;;  %v796_v41 = vsub.s32 1, %v2277_v26 }
 0x563   : > { %v2328_v44 = vadd.f32 %v1038_v42, %v2259_v62  ;;  %v2331_v46 = vadd.f32 %v1038_v42, %v2261_v0  ;;  %v775_v62 = vld [vmem:[%s2450_s8 + $0x18] sm:$0xff]  ;;  %v772_v0 = vld [vmem:[%s2450_s8] sm:$0xff]  ;;  %v793_v42 = vrot.slane %v788_v40, %v2285_v30 }
 0x564   : > { %v1705_v51 = vpack.c.bf16 %v775_v62, %v773_v29  ;;  %v1707_v55 = vpack.c.bf16 %v774_v52, %v772_v0 }
 0x565   : > { %v1045_v47 = vsel %vm511_vm0, %v2328_v44, -inf  ;;  %v1042_v49 = vsel %vm511_vm0, %v2331_v46, -inf }
 0x566   : > { %1046 = vmax.xlane.f32.xlu1 %v1045_v47  ;;  %1043 = vmax.xlane.f32.xlu0 %v1042_v49  ;;  %v797_v47 = vrot.slane %v788_v40, %v796_v41  ;;  %v1300_v41 = vld [vmem:[#allocation6 + $0x98] sm:$0xff] }
 0x567   : > { %1706 = vmatprep.subr.bf16.mxu1 %v1705_v51 }
 0x568   : > { %1708 = vmatpush1.bf16.msra.mxu1 %v1707_v55  ;;  %v1282_v55 = vld [vmem:[#allocation6 + $0x8] sm:$0xff] }
 0x569   : > { %1710 = vmatprep.subr.bf16.mxu1 %v1709_v56  ;;  %v1284_v56 = vld [vmem:[#allocation6 + $0x18] sm:$0xff] }
 0x56a   : > { %v1737_v58 = vpack.c.bf16 %v1284_v56, %v1282_v55  ;;  %v1305_v56 = vld [vmem:[#allocation6 + $0xc0] sm:$0xff] }
 0x56c   : > { %1712 = vmatpush1.bf16.msra.mxu1 %v1711_v61  ;;  %v1288_v61 = vld [vmem:[#allocation6 + $0x38] sm:$0xff]  ;;  %1738 = vmatprep.subr.bf16.mxu0 %v1737_v58 }
 0x56d   : > { %1714 = vmatprep.subr.bf16.mxu1 %v1713_v63  ;;  %v1739_v63 = vpack.c.bf16 %v1283_v59, %v1281_v57  ;;  %v1741_v1 = vpack.c.bf16 %v1288_v61, %v1286_v60  ;;  %v1307_v57 = vld [vmem:[#allocation6 + $0xd0] sm:$0xff]  ;;  %v1310_v59 = vld [vmem:[#allocation6 + $0xe8] sm:$0xff]  ;;  %v1312_v60 = vld [vmem:[#allocation6 + $0xf8] sm:$0xff] }
 0x56e   : > { %v1763_v58 = vpack.c.bf16 %v1307_v57, %v1305_v56  ;;  %v1765_v61 = vpack.c.bf16 %v1312_v60, %v1310_v59 }
 0x56f   : > { %1740 = vmatpush1.bf16.msra.mxu0 %v1739_v63  ;;  %v1309_v63 = vld [vmem:[#allocation6 + $0xe0] sm:$0xff] }
 0x570   : > { %1716 = vmatpush1.bf16.msra.mxu1 %v1715_v4  ;;  %v1290_v4 = vld [vmem:[#allocation6 + $0x48] sm:$0xff]  ;;  %1742 = vmatprep.subr.bf16.mxu0 %v1741_v1  ;;  %v1311_v1 = vld [vmem:[#allocation6 + $0xf0] sm:$0xff] }
 0x571   : > { %1718 = vmatprep.subr.bf16.mxu1 %v1717_v9  ;;  %v1745_v7 = vpack.c.bf16 %v1292_v5, %v1290_v4  ;;  %v1291_v9 = vld [vmem:[#allocation6 + $0x50] sm:$0xff]  ;;  %v1767_v2 = vpack.c.bf16 %v1311_v1, %v1309_v63  ;;  %v1316_v4 = vld [vmem:[#allocation6 + $0x118] sm:$0xff] }
 0x572   : > { %v1769_v5 = vpack.c.bf16 %v1316_v4, %v1314_v3  ;;  %v1988_v3 = vmov 1966171168  }
 0x573   : > { %1744 = vmatpush1.bf16.msra.mxu0 %v1743_v6  ;;  %v1313_v6 = vld [vmem:[#allocation6 + $0x100] sm:$0xff]  ;;  %v1431_v4 = vunpack.c.l.s4 %v1988_v3 }
 0x574   : > { %1720 = vmatpush1.bf16.msra.mxu1 %v1719_v11  ;;  %v1296_v11 = vld [vmem:[#allocation6 + $0x78] sm:$0xff]  ;;  %1746 = vmatprep.subr.bf16.mxu0 %v1745_v7  ;;  %v1315_v7 = vld [vmem:[#allocation6 + $0x110] sm:$0xff] }
 0x575   : > { %1730 = vmatprep.subr.bf16.mxu1 %v1729_v27 }
 0x577   : > { %1562 = vmatmul.mubr.msk.f32.vlgmr.msra.gmra.mrb[2].mxu1 %vm800_vm2, %v771_v39  ;;  %v1747_v39 = vpack.c.bf16 %v1291_v9, %v1289_v8  ;;  %v1771_v8 = vpack.c.bf16 %v1315_v7, %v1313_v6  ;;  %v1318_v9 = vld [vmem:[#allocation6 + $0x128] sm:$0xff] }
 0x578   : > { %1246 = vmatprep.mubr.f32.mxu1 %v1987_v38  ;;  %1732 = vmatpush1.bf16.msra.mxu1 %v1731_v33 }
 0x579   : > { %1734 = vmatprep.subr.bf16.mxu1 %v1733_v34  ;;  %1748 = vmatpush1.bf16.msra.mxu0 %v1747_v39  ;;  %v1317_v39 = vld [vmem:[#allocation6 + $0x120] sm:$0xff] }
 0x57c   : > { %1736 = vmatpush1.bf16.msra.mxu1 %v1735_v37 }
 0x5f3   : > { %v2390_v12 = vpop.xlane.xlu1 %1046  ;;  %v2392_v13 = vpop.xlane.xlu0 %1043 }
 0x5f4   : > { %v1049_v14 = vsub.f32 %v2328_v44, %v2390_v12  ;;  %v1048_v15 = vsub.f32 %v2331_v46, %v2392_v13 }
 0x5f6   : > { %v1052_v16 = vmul.f32 1.442695, %v1049_v14  ;;  %v1050_v17 = vmul.f32 1.442695, %v1048_v15  ;;  %v1749_v14 = vpack.c.bf16 %v1296_v11, %v1294_v10  ;;  %v1293_v15 = vld [vmem:[#allocation6 + $0x60] sm:$0xff]  ;;  %v1320_v10 = vld [vmem:[#allocation6 + $0x138] sm:$0xff] }
 0x5f7   : > { %v1773_v11 = vpack.c.bf16 %v1320_v10, %v1318_v9 }
 0x5f8   : > { %1858 = vpow2.f32 %v1052_v16  ;;  %v1295_v16 = vld [vmem:[#allocation6 + $0x70] sm:$0xff]  ;;  %1750 = vmatprep.subr.bf16.mxu0 %v1749_v14 }
 0x5f9   : > { %1860 = vpow2.f32 %v1050_v17  ;;  %v1751_v17 = vpack.c.bf16 %v1295_v16, %v1293_v15  ;;  %v1319_v14 = vld [vmem:[#allocation6 + $0x130] sm:$0xff] }
 0x5fa   : > { %v1775_v15 = vpack.c.bf16 %v1319_v14, %v1317_v39 }
 0x5fb   : > { %1752 = vmatpush1.bf16.msra.mxu0 %v1751_v17 }
 0x602   : > { %v1859_v18 = vpop.eup %1858 }
 0x603   : > { %v1861_v19 = vpop.eup %1860  ;;  %v1057_v20 = vsel %vm511_vm0, %v1859_v18, 0.0 }
 0x604   : > { %1058 = vadd.xlane.f32.xlu1 %v1057_v20  ;;  %v1054_v21 = vsel %vm511_vm0, %v1861_v19, 0.0 }
 0x605   : > { %1055 = vadd.xlane.f32.xlu0 %v1054_v21 }
 0x64a   : > { %v870_v49 = vpop.f32.mrb[2].mxu1 }
 0x64b   : > { %v2405_v29 = vadd.f32 %v870_v49, %v793_v42  ;;  %v872_v62 = vpop.f32.mrb[3].mxu1  ;;  %v1302_v49 = vld [vmem:[#allocation6 + $0xa8] sm:$0xff] }
 0x64c   : > { %v2407_v0 = vadd.f32 %v872_v62, %v797_v47  ;;  %v1299_v47 = vld [vmem:[#allocation6 + $0x90] sm:$0xff]  ;;  %v1304_v62 = vld [vmem:[#allocation6 + $0xb8] sm:$0xff] }
 0x64d   : > { %v1401_v51 = vmul.f32 %v2405_v29, %v2405_v29 }
 0x64e   : > { %v1402_v52 = vmul.f32 %v2407_v0, %v2407_v0 }
 0x64f   : > { %v1404_v53 = vsel %vm1403_vm3, %v1401_v51, 0.0  ;;  %v1757_v51 = vpack.c.bf16 %v1304_v62, %v1302_v49 }
 0x650   : > { %v1406_v54 = vsel %vm1405_vm4, %v1402_v52, 0.0  ;;  %v1301_v52 = vld [vmem:[#allocation6 + $0xa0] sm:$0xff] }
 0x651   : > { %v1407_v30 = vadd.f32 %v1406_v54, %v1404_v53  ;;  %v1303_v53 = vld [vmem:[#allocation6 + $0xb0] sm:$0xff] }
 0x652   : > { %v1759_v54 = vpack.c.bf16 %v1303_v53, %v1301_v52 }
 0x653   : > { %1408 = vadd.xlane.f32.xlu0 %v1407_v30  ;;  %v1308_v30 = vld [vmem:[#allocation6 + $0xd8] sm:$0xff] }
 0x691   : > { %v1059_v18 = vpop.xlane.xlu1 %1058 }
 0x692   : > { %1862 = vlog2.f32 %v1059_v18  ;;  %v1056_v19 = vpop.xlane.xlu0 %1055 }
 0x693   : > { %1864 = vlog2.f32 %v1056_v19 }
 0x69c   : > { %v1863_v20 = vpop.eup %1862 }
 0x69d   : > { %v1865_v21 = vpop.eup %1864  ;;  %v1063_v22 = vmul.f32 0.6931472, %v1863_v20 }
 0x69e   : > { %v1061_v23 = vmul.f32 0.6931472, %v1865_v21 }
 0x69f   : > { %v1065_v24 = vadd.f32 %v1063_v22, %v2390_v12 }
 0x6a0   : > { %v1064_v27 = vadd.f32 %v1061_v23, %v2392_v13  ;;  %v1298_v13 = vld [vmem:[#allocation6 + $0x88] sm:$0xff] }
 0x6a1   : > { %v1067_v28 = vsub.f32 -3.1780539, %v1065_v24  ;;  %v1753_v42 = vpack.c.bf16 %v1300_v41, %v1298_v13 }
 0x6a2   : > { %v1066_v31 = vsub.f32 -3.1780539, %v1064_v27 }
 0x6a3   : > { %v1069_v32 = vadd.f32 %v1067_v28, %v2328_v44  ;;  %v1297_v44 = vld [vmem:[#allocation6 + $0x80] sm:$0xff]  ;;  %1754 = vmatprep.subr.bf16.mxu0 %v1753_v42 }
 0x6a4   : > { %v1068_v33 = vadd.f32 %v1066_v31, %v2331_v46  ;;  %v1755_v46 = vpack.c.bf16 %v1299_v47, %v1297_v44 }
 0x6a5   : > { %v1564_v34 = vadd.f32 3.1780539, %v1069_v32 }
 0x6a6   : > { %v1563_v35 = vadd.f32 3.1780539, %v1068_v33  ;;  %1756 = vmatpush1.bf16.msra.mxu0 %v1755_v46 }
 0x6a7   : > { %v1074_v37 = vmul.f32 1.442695, %v1564_v34  ;;  %1758 = vmatprep.subr.bf16.mxu0 %v1757_v51 }
 0x6a8   : > { %v1072_v36 = vmul.f32 1.442695, %v1563_v35 }
 0x6aa   : > { %1866 = vpow2.f32 %v1072_v36  ;;  %1760 = vmatpush1.bf16.msra.mxu0 %v1759_v54 }
 0x6ab   : > { %1868 = vpow2.f32 %v1074_v37 }
 0x6b4   : > { %v1867_v40 = vpop.eup %1866 }
 0x6b5   : > { %1567 = vmatmul.mubr.msk.f32.vlgmr.msra.gmra.mrb[4].mxu1 %vm511_vm0, %v1867_v40  ;;  %v1869_v12 = vpop.eup %1868 }
 0x6b6   : > { %1252 = vmatprep.mubr.f32.mxu1 %v1987_v38  ;;  %v1306_v38 = vld [vmem:[#allocation6 + $0xc8] sm:$0xff] }
 0x6b7   : > { %v1761_v55 = vpack.c.bf16 %v1308_v30, %v1306_v38 }
 0x6b9   : > { %1568 = vmatmul.mubr.msk.f32.gmra.mrb[6].mxu1 %vm511_vm0, %v1869_v12  ;;  %1762 = vmatprep.subr.bf16.mxu0 %v1761_v55 }
 0x6ba   : > { %1764 = vmatpush1.bf16.msra.mxu0 %v1763_v58 }
 0x6bb   : > { %1766 = vmatprep.subr.bf16.mxu0 %v1765_v61 }
 0x6be   : > { %1768 = vmatpush1.bf16.msra.mxu0 %v1767_v2 }
 0x6bf   : > { %1770 = vmatprep.subr.bf16.mxu0 %v1769_v5 }
 0x6c2   : > { %1772 = vmatpush1.bf16.msra.mxu0 %v1771_v8 }
 0x6c3   : > { %1774 = vmatprep.subr.bf16.mxu0 %v1773_v11 }
 0x6c6   : > { %1776 = vmatpush1.bf16.msra.mxu0 %v1775_v15 }
 0x6e0   : > { %v1409_v42 = vpop.xlane.xlu0 %1408 }
 0x6e1   : > { %v1410_v44 = vmax.f32 %v1409_v42, 1e-24 }
 0x6e3   : > { %1870 = vrsqrt.f32 %v1410_v44 }
 0x6ed   : > { %v1871_v51 = vpop.eup %1870 }
 0x6ee   : > { %v1412_v38 = vmul.f32 %v1871_v51, %v2405_v29  ;;  %v1413_v55 = vmul.f32 %v1871_v51, %v2407_v0  ;;  %v1432_v29 = vunpack.c.0.s8 %v1431_v4 }
 0x6f0   : > { %v1435_v0 = vsub.s32 %v1432_v29, %v2277_v26 }
 0x788   : > { %v1248_v16 = vpop.f32.mrb[4].mxu1 }
 0x789   : > { %v1259_v17 = vmul.f32 %v1248_v16, %v2295_v43  ;;  %v1250_v18 = vpop.f32.mrb[5].mxu1 }
 0x78a   : > { %v1260_v19 = vmul.f32 %v1250_v18, %v2297_v45 }
 0x78c   : > { %v1254_v20 = vpop.f32.mrb[6].mxu1  ;;  %v1270_v27 = vsel %vm511_vm0, %v1260_v19, 0.0 }
 0x78d   : > { %v1261_v21 = vmul.f32 %v1254_v20, %v2299_v48  ;;  %v1256_v22 = vpop.f32.mrb[7].mxu1 }
 0x78e   : > { %v1262_v23 = vmul.f32 %v1256_v22, %v2301_v50 }
 0x78f   : > { %v1263_v24 = vadd.f32 %v1261_v21, %v1259_v17 }
 0x790   : > { %v1271_v28 = vsel %vm511_vm0, %v1262_v23, 0.0 }
 0x791   : > { %v1264_v31 = vrot.slane %v1263_v24, 4  ;;  %v1272_v32 = vadd.f32 %v1271_v28, %v1270_v27 }
 0x793   : > { %v1265_v33 = vadd.f32 %v1264_v31, %v1263_v24  ;;  %v1273_v34 = vrot.slane %v1272_v32, 4 }
 0x795   : > { %v1266_v35 = vrot.slane %v1265_v33, 2  ;;  %v1274_v43 = vadd.f32 %v1273_v34, %v1272_v32 }
 0x797   : > { %v1267_v36 = vadd.f32 %v1266_v35, %v1265_v33  ;;  %v1275_v37 = vrot.slane %v1274_v43, 2 }
 0x799   : > { %v1268_v45 = vrot.slane %v1267_v36, 1  ;;  %v1276_v40 = vadd.f32 %v1275_v37, %v1274_v43 }
 0x79b   : > { %v1277_v12 = vrot.slane %v1276_v40, 1  ;;  %v1269_v48 = vadd.f32 %v1268_v45, %v1267_v36 }
 0x79d   : > { %v1278_v13 = vadd.f32 %v1277_v12, %v1276_v40  ;;  %v1279_v50 = vmul.f32 %v1269_v48, %v1269_v48 }
 0x79f   : > { %v1280_v41 = vmul.f32 %v1278_v13, %v1278_v13 }
 0x7a1   : > { %1569 = vmatprep.mubr.msk.f32.mxu0 %vm511_vm0, %v1280_v41 }
 0x7a2   : > { %1389 = vmatmul.mubr.f32.vlgmr.msra.gmra.mrb[8].mxu0 %v1279_v50 }
 0x875   : > { %v1390_v47 = vpop.f32.mrb[8].mxu0 }
 0x876   : > { %v1395_v46 = vmax.f32 %v1390_v47, 1e-24  ;;  %v1392_v49 = vpop.f32.mrb[9].mxu0 }
 0x877   : > { %v1396_v62 = vmax.f32 %v1392_v49, 1e-24 }
 0x878   : > { %1872 = vrsqrt.f32 %v1395_v46 }
 0x879   : > { %1874 = vrsqrt.f32 %v1396_v62 }
 0x882   : > { %v1873_v52 = vpop.eup %1872 }
 0x883   : > { %v1875_v53 = vpop.eup %1874  ;;  %v1399_v54 = vmul.f32 %v1873_v52, %v1269_v48 }
 0x884   : > { %v1400_v30 = vmul.f32 %v1875_v53, %v1278_v13 }
 0x885   : > { %v1414_v56 = vadd.f32 %v1412_v38, %v1399_v54 }
 0x886   : > { %v1415_v57 = vadd.f32 %v1413_v55, %v1400_v30 }
 0x887   : > { %v1416_v58 = vmul.f32 %v1414_v56, %v1414_v56 }
 0x888   : > { %v1417_v59 = vmul.f32 %v1415_v57, %v1415_v57 }
 0x889   : > { %v1418_v60 = vsel %vm1403_vm3, %v1416_v58, 0.0 }
 0x88a   : > { %v1419_v61 = vsel %vm1405_vm4, %v1417_v59, 0.0 }
 0x88b   : > { %v1420_v63 = vadd.f32 %v1419_v61, %v1418_v60 }
 0x88d   : > { %1421 = vadd.xlane.f32.xlu1 %v1420_v63 }
 0x91a   : > { %v1422_v1 = vpop.xlane.xlu1 %1421 }
 0x91b   : > { %v1423_v2 = vmax.f32 %v1422_v1, 1e-24 }
 0x91d   : > { %1876 = vrsqrt.f32 %v1423_v2 }
 0x927   : > { %v1877_v5 = vpop.eup %1876 }
 0x928   : > { %v1425_v6 = vmul.f32 %v1877_v5, %v1414_v56  ;;  %v1426_v7 = vmul.f32 %v1877_v5, %v1415_v57 }
 0x92a   : > { %v1429_v8 = vcombine.low %v1425_v6, %v1426_v7 }
 0x92c   : > { %v1436_v9 = vrot.slane %v1429_v8, %v1435_v0 }
 0x92e   : > { %v1443_v10 = vrot.slane %v1436_v9, %v1435_v0 }
 0x930   : > { %1449 = vst.msk [vmem:[%s496_s24] sm:$0x3] %vm1447_vm5, %v1443_v10 }
 0x931 PF: > { %s2472_s26 = sld [smem:[#allocation9_spill]] }
 0x937   : > { %s25_s25 = sadd.s32 1, %s2472_s26  }
 0x938   : > { %p22_p5 = scmp.ge.s32.totalorder %s25_s25, 4  }
 0x93a   :  { %24 = sbr.rel (!%p22_p5) target bundleno = 4 (0x4), region = 119 }
 0x941   :  { %1469 = vsyncpa [#allocation3], 1 }
 0x942   :  { %1471 = vsyncpa [#allocation3 + $0x1], 1 }
 0x943   :  { %1472 = vsyncpa [#allocation5], 1 }

</bundles_post_ra>
